<compile_context>
chip_gen: v6e
topology: v6e:2x2x1
jax: 0.10.0
libtpu: 0.0.40
codegen_flags: <defaults>
</compile_context>

<pallas_src>
import functools
import math

import jax
import jax.numpy as jnp
from jax.experimental import pallas as pl
from jax.experimental.pallas import tpu as pltpu

# MXU operand dtype: bf16 is native on the v5e/v6e/v7x MXU; accumulation f32.
MXU_DTYPE = jnp.bfloat16


# ----------------------------------------------------------------------------
# helpers (used inside the kernel)
# ----------------------------------------------------------------------------
def _layer_norm(x, gamma, beta, eps):
    mu = jnp.mean(x, axis=-1, keepdims=True)
    xc = x - mu
    var = jnp.mean(xc * xc, axis=-1, keepdims=True)
    return xc * jax.lax.rsqrt(var + eps) * gamma + beta


def _gelu(x):
    # tanh-approximate GELU
    # TODO(synk): swap to exact erf-GELU to match HF BertIntermediate default.
    return 0.5 * x * (1.0 + jnp.tanh(0.7978845608028654
                                     * (x + 0.044715 * x * x * x)))


# ----------------------------------------------------------------------------
# fused BERT-encoder + regression-head kernel (grid axis = layer index)
# ----------------------------------------------------------------------------
def _bert_kernel(x_emb_ref, mask_ref, eg_ref, eb_ref,
                 wqkv_ref, bqkv_ref, wo_ref, bo_ref, g1_ref, be1_ref,
                 w1_ref, b1_ref, w2_ref, b2_ref, g2_ref, be2_ref,
                 wc_ref, bc_ref, wf1_ref, bf1_ref, wf2_ref, bf2_ref,
                 out_ref, x_vmem,
                 *, batch, seq, num_heads, eps, mxu_dtype):
    layer = pl.program_id(0)
    hidden = x_vmem.shape[-1]
    head_dim = hidden // num_heads
    scale = 1.0 / math.sqrt(head_dim)

    # ---- grid step 0: embedding LayerNorm into the resident activation buffer
    @pl.when(layer == 0)
    def _():
        x_vmem[...] = _layer_norm(x_emb_ref[...], eg_ref[...], eb_ref[...], eps)

    x = x_vmem[...]                                               # (B*S, H) f32

    # ---- fused Q/K/V projection: one [B*S, H] @ [H, 3H] matmul
    qkv = (jnp.dot(x.astype(mxu_dtype), wqkv_ref[0],
                   preferred_element_type=jnp.float32) + bqkv_ref[0])

    # ---- multi-head self-attention, entirely in-kernel (2-D unrolled blocks)
    batch_rows = []
    for b_i in range(batch):
        rows = slice(b_i * seq, (b_i + 1) * seq)
        # additive key mask folded in-kernel from the raw (B, S) 0/1 mask
        m_add = (1.0 - mask_ref[b_i:b_i + 1, :]) * -10000.0       # (1, S)
        head_cols = []
        for h in range(num_heads):
            c0 = h * head_dim
            qh = qkv[rows, c0:c0 + head_dim]                      # (S, Dh)
            kh = qkv[rows, hidden + c0:hidden + c0 + head_dim]
            vh = qkv[rows, 2 * hidden + c0:2 * hidden + c0 + head_dim]
            s_ = jax.lax.dot_general(
                qh.astype(mxu_dtype), kh.astype(mxu_dtype),
                (((1,), (1,)), ((), ())),
                preferred_element_type=jnp.float32) * scale       # (S, S)
            s_ = s_ + m_add
            s_ = s_ - jnp.max(s_, axis=-1, keepdims=True)
            p_ = jnp.exp(s_)
            p_ = p_ * pl.reciprocal(jnp.sum(p_, axis=-1, keepdims=True),
                                    approx=True)
            head_cols.append(
                jnp.dot(p_.astype(mxu_dtype), vh.astype(mxu_dtype),
                        preferred_element_type=jnp.float32))       # (S, Dh)
        batch_rows.append(jnp.concatenate(head_cols, axis=-1))     # (S, H)
    ctx = jnp.concatenate(batch_rows, axis=0)                      # (B*S, H)

    # ---- attention output projection + residual + LayerNorm
    attn = (jnp.dot(ctx.astype(mxu_dtype), wo_ref[0],
                    preferred_element_type=jnp.float32) + bo_ref[0])
    x = _layer_norm(attn + x, g1_ref[0], be1_ref[0], eps)

    # ---- FFN (GELU) + residual + LayerNorm
    ffn = (jnp.dot(x.astype(mxu_dtype), w1_ref[0],
                   preferred_element_type=jnp.float32) + b1_ref[0])
    ffn = _gelu(ffn)
    ffn = (jnp.dot(ffn.astype(mxu_dtype), w2_ref[0],
                   preferred_element_type=jnp.float32) + b2_ref[0])
    x = _layer_norm(ffn + x, g2_ref[0], be2_ref[0], eps)

    x_vmem[...] = x

    # ---- last grid step: fused regression head on the CLS tokens
    @pl.when(layer == pl.num_programs(0) - 1)
    def _():
        cls = jnp.concatenate([x[b_i * seq:b_i * seq + 1, :]
                               for b_i in range(batch)], axis=0)   # (B, H)
        h0 = jnp.maximum(
            jnp.dot(cls.astype(mxu_dtype), wc_ref[...],
                    preferred_element_type=jnp.float32) + bc_ref[...], 0.0)
        h1 = jnp.maximum(
            jnp.dot(h0.astype(mxu_dtype), wf1_ref[...],
                    preferred_element_type=jnp.float32) + bf1_ref[...], 0.0)
        y = (jnp.dot(h1.astype(mxu_dtype), wf2_ref[...],
                     preferred_element_type=jnp.float32) + bf2_ref[...])
        out_ref[...] = y.astype(out_ref.dtype)


# ----------------------------------------------------------------------------
# forward pass
# ----------------------------------------------------------------------------
def bert_regression_forward(params, input_ids, attention_mask, *, num_heads):
    b, s = input_ids.shape
    num_layers, hidden, three_h = params["wqkv"].shape
    inter = params["w1"].shape[2]
    reg = params["w_cls"].shape[1]
    assert hidden % num_heads == 0

    # --- embeddings: gather/sum stays in plain JAX (XLA gather); the embedding
    #     LayerNorm is fused into grid step 0 of the kernel.
    we = jnp.take(params["word_emb"], input_ids, axis=0)           # (B, S, H)
    pe = params["pos_emb"][:s][None, :, :]
    te = params["type_emb"][0][None, None, :]                      # token_type_ids == 0
    x_emb = (we + pe + te).reshape(b * s, hidden).astype(jnp.float32)

    mask_f = attention_mask.astype(jnp.float32)                    # (B, S)

    def full(shape):
        return pl.BlockSpec(tuple(shape), lambda l: (0,) * len(shape))

    def per_layer(shape):
        return pl.BlockSpec((1,) + tuple(shape),
                            lambda l: (l,) + (0,) * len(shape))

    kernel = functools.partial(
        _bert_kernel, batch=b, seq=s, num_heads=num_heads,
        eps=1e-12, mxu_dtype=MXU_DTYPE)

    out = pl.pallas_call(
        kernel,
        out_shape=jax.ShapeDtypeStruct((b, 1), jnp.float32),
        grid=(num_layers,),
        in_specs=[
            full((b * s, hidden)),            # x_emb (pre-LN embedding sum)
            full((b, s)),                     # raw attention mask (0/1 floats)
            full((1, hidden)),                # emb_ln_g
            full((1, hidden)),                # emb_ln_b
            per_layer((hidden, three_h)),     # wqkv (fused)
            per_layer((1, three_h)),          # bqkv
            per_layer((hidden, hidden)),      # wo
            per_layer((1, hidden)),           # bo
            per_layer((1, hidden)),           # ln1_g
            per_layer((1, hidden)),           # ln1_b
            per_layer((hidden, inter)),       # w1
            per_layer((1, inter)),            # b1
            per_layer((inter, hidden)),       # w2
            per_layer((1, hidden)),           # b2
            per_layer((1, hidden)),           # ln2_g
            per_layer((1, hidden)),           # ln2_b
            full((hidden, reg)),              # w_cls
            full((1, reg)),                   # b_cls
            full((reg, reg)),                 # w_fc1
            full((1, reg)),                   # b_fc1
            full((reg, 1)),                   # w_fc2
            full((1, 1)),                     # b_fc2
        ],
        out_specs=pl.BlockSpec((b, 1), lambda l: (0, 0)),
        scratch_shapes=[pltpu.VMEM((b * s, hidden), jnp.float32)],
        compiler_params=pltpu.CompilerParams(
            dimension_semantics=("arbitrary",)),
    )(x_emb, mask_f,
      params["emb_ln_g"], params["emb_ln_b"],
      params["wqkv"], params["bqkv"], params["wo"], params["bo"],
      params["ln1_g"], params["ln1_b"],
      params["w1"], params["b1"], params["w2"], params["b2"],
      params["ln2_g"], params["ln2_b"],
      params["w_cls"], params["b_cls"], params["w_fc1"], params["b_fc1"],
      params["w_fc2"], params["b_fc2"])

    return out[:, 0]                                               # .squeeze(-1)


# ----------------------------------------------------------------------------
# Deterministic parameter init (synthetic, not a checkpoint).
# Weights are stacked per layer (leading axis = layer) and stored in bf16 for
# the MXU; biases / LayerNorm params stay f32.
# ----------------------------------------------------------------------------
def init_params(key, *, vocab=100, hidden=32, num_layers=2, num_heads=4,
                intermediate=64, max_pos=16, reg_dim=16):
    del num_heads  # kept in the signature for clarity; passed to forward separately
    keys = iter(jax.random.split(key, 32))

    def nrm(shape, scale=0.02):
        return scale * jax.random.normal(next(keys), shape, dtype=jnp.float32)

    def w(shape):                       # MXU-facing weight -> bf16
        return nrm(shape).astype(MXU_DTYPE)

    return {
        "word_emb": nrm((vocab, hidden)),
        "pos_emb": nrm((max_pos, hidden)),
        "type_emb": nrm((2, hidden)),
        "emb_ln_g": jnp.ones((1, hidden), jnp.float32),
        "emb_ln_b": jnp.zeros((1, hidden), jnp.float32),
        # stacked per-layer encoder weights (Q/K/V fused along the output dim)
        "wqkv": w((num_layers, hidden, 3 * hidden)),
        "bqkv": nrm((num_layers, 1, 3 * hidden)),
        "wo":   w((num_layers, hidden, hidden)),
        "bo":   nrm((num_layers, 1, hidden)),
        "ln1_g": jnp.ones((num_layers, 1, hidden), jnp.float32),
        "ln1_b": jnp.zeros((num_layers, 1, hidden), jnp.float32),
        "w1":   w((num_layers, hidden, intermediate)),
        "b1":   nrm((num_layers, 1, intermediate)),
        "w2":   w((num_layers, intermediate, hidden)),
        "b2":   nrm((num_layers, 1, hidden)),
        "ln2_g": jnp.ones((num_layers, 1, hidden), jnp.float32),
        "ln2_b": jnp.zeros((num_layers, 1, hidden), jnp.float32),
        # regression head (nn.Linear stores weight [out,in]; we store [in,out])
        "w_cls": w((hidden, reg_dim)),  "b_cls": nrm((1, reg_dim)),
        "w_fc1": w((reg_dim, reg_dim)), "b_fc1": nrm((1, reg_dim)),
        "w_fc2": w((reg_dim, 1)),       "b_fc2": nrm((1, 1)),
    }


# ----------------------------------------------------------------------------
if __name__ == "__main__":
    B, S = 2, 8
    VOCAB, HIDDEN, LAYERS, HEADS, INTER, REG_DIM = 100, 32, 2, 4, 64, 16

    key = jax.random.PRNGKey(0)
    k_param, k_ids = jax.random.split(key)

    params = init_params(k_param, vocab=VOCAB, hidden=HIDDEN, num_layers=LAYERS,
                         num_heads=HEADS, intermediate=INTER, max_pos=S,
                         reg_dim=REG_DIM)

    input_ids = jax.random.randint(k_ids, (B, S), 0, VOCAB, dtype=jnp.int32)
    attention_mask = jnp.array([[1, 1, 1, 1, 1, 1, 1, 1],
                                [1, 1, 1, 1, 1, 1, 0, 0]], dtype=jnp.int32)

    fwd = jax.jit(functools.partial(bert_regression_forward, num_heads=HEADS))
    out = jax.block_until_ready(fwd(params, input_ids, attention_mask))

    assert out.shape == (B,), out.shape
    assert bool(jnp.all(jnp.isfinite(out)))
    print("KERNEL_OK")
</pallas_src>

<mosaic_0001>
module attributes {stable_mosaic.version = 11 : i64} {
  func.func @_bert_kernel(%arg0: i32, %arg1: memref<16x32xf32, #tpu.memory_space<vmem>>, %arg2: memref<2x8xf32, #tpu.memory_space<vmem>>, %arg3: memref<1x32xf32, #tpu.memory_space<vmem>>, %arg4: memref<1x32xf32, #tpu.memory_space<vmem>>, %arg5: memref<1x32x96xbf16, #tpu.memory_space<vmem>>, %arg6: memref<1x1x96xf32, #tpu.memory_space<vmem>>, %arg7: memref<1x32x32xbf16, #tpu.memory_space<vmem>>, %arg8: memref<1x1x32xf32, #tpu.memory_space<vmem>>, %arg9: memref<1x1x32xf32, #tpu.memory_space<vmem>>, %arg10: memref<1x1x32xf32, #tpu.memory_space<vmem>>, %arg11: memref<1x32x64xbf16, #tpu.memory_space<vmem>>, %arg12: memref<1x1x64xf32, #tpu.memory_space<vmem>>, %arg13: memref<1x64x32xbf16, #tpu.memory_space<vmem>>, %arg14: memref<1x1x32xf32, #tpu.memory_space<vmem>>, %arg15: memref<1x1x32xf32, #tpu.memory_space<vmem>>, %arg16: memref<1x1x32xf32, #tpu.memory_space<vmem>>, %arg17: memref<32x16xbf16, #tpu.memory_space<vmem>>, %arg18: memref<1x16xf32, #tpu.memory_space<vmem>>, %arg19: memref<16x16xbf16, #tpu.memory_space<vmem>>, %arg20: memref<1x16xf32, #tpu.memory_space<vmem>>, %arg21: memref<16x1xbf16, #tpu.memory_space<vmem>>, %arg22: memref<1x1xf32, #tpu.memory_space<vmem>>, %arg23: memref<2x1xf32, #tpu.memory_space<vmem>>, %arg24: memref<16x32xf32, #tpu.memory_space<vmem>>) attributes {dimension_semantics = [#tpu.dimension_semantics<arbitrary>], iteration_bounds = array<i64: 2>, scalar_prefetch = 0 : i64, scratch_operands = 1 : i64, tpu.core_type = #tpu.core_type<tc>, window_params = [{pipeline_mode = #tpu.pipeline_mode<synchronous>, transform_indices = @transform_0, window_bounds = array<i64: 16, 32>}, {pipeline_mode = #tpu.pipeline_mode<synchronous>, transform_indices = @transform_1, window_bounds = array<i64: 2, 8>}, {pipeline_mode = #tpu.pipeline_mode<synchronous>, transform_indices = @transform_2, window_bounds = array<i64: 1, 32>}, {pipeline_mode = #tpu.pipeline_mode<synchronous>, transform_indices = @transform_3, window_bounds = array<i64: 1, 32>}, {transform_indices = @transform_4, window_bounds = array<i64: 1, 32, 96>}, {transform_indices = @transform_5, window_bounds = array<i64: 1, 1, 96>}, {transform_indices = @transform_6, window_bounds = array<i64: 1, 32, 32>}, {transform_indices = @transform_7, window_bounds = array<i64: 1, 1, 32>}, {transform_indices = @transform_8, window_bounds = array<i64: 1, 1, 32>}, {transform_indices = @transform_9, window_bounds = array<i64: 1, 1, 32>}, {transform_indices = @transform_10, window_bounds = array<i64: 1, 32, 64>}, {transform_indices = @transform_11, window_bounds = array<i64: 1, 1, 64>}, {transform_indices = @transform_12, window_bounds = array<i64: 1, 64, 32>}, {transform_indices = @transform_13, window_bounds = array<i64: 1, 1, 32>}, {transform_indices = @transform_14, window_bounds = array<i64: 1, 1, 32>}, {transform_indices = @transform_15, window_bounds = array<i64: 1, 1, 32>}, {pipeline_mode = #tpu.pipeline_mode<synchronous>, transform_indices = @transform_16, window_bounds = array<i64: 32, 16>}, {pipeline_mode = #tpu.pipeline_mode<synchronous>, transform_indices = @transform_17, window_bounds = array<i64: 1, 16>}, {pipeline_mode = #tpu.pipeline_mode<synchronous>, transform_indices = @transform_18, window_bounds = array<i64: 16, 16>}, {pipeline_mode = #tpu.pipeline_mode<synchronous>, transform_indices = @transform_19, window_bounds = array<i64: 1, 16>}, {pipeline_mode = #tpu.pipeline_mode<synchronous>, transform_indices = @transform_20, window_bounds = array<i64: 16, 1>}, {pipeline_mode = #tpu.pipeline_mode<synchronous>, transform_indices = @transform_21, window_bounds = array<i64: 1, 1>}, {pipeline_mode = #tpu.pipeline_mode<synchronous>, transform_indices = @transform_22, window_bounds = array<i64: 2, 1>}]} {
    %c0_i32 = arith.constant 0 : i32
    %0 = arith.cmpi eq, %arg0, %c0_i32 : i32
    %1 = arith.extui %0 : i1 to i32
    %c0_i32_0 = arith.constant 0 : i32
    %2 = arith.cmpi ne, %1, %c0_i32_0 : i32
    scf.if %2 {
      %c0_105 = arith.constant 0 : index
      %c0_106 = arith.constant 0 : index
      %300 = vector.load %arg1[%c0_105, %c0_106] : memref<16x32xf32, #tpu.memory_space<vmem>>, vector<16x32xf32>
      %c0_107 = arith.constant 0 : index
      %c0_108 = arith.constant 0 : index
      %301 = vector.load %arg3[%c0_107, %c0_108] : memref<1x32xf32, #tpu.memory_space<vmem>>, vector<1x32xf32>
      %c0_109 = arith.constant 0 : index
      %c0_110 = arith.constant 0 : index
      %302 = vector.load %arg4[%c0_109, %c0_110] : memref<1x32xf32, #tpu.memory_space<vmem>>, vector<1x32xf32>
      %cst_111 = arith.constant dense<0.000000e+00> : vector<16xf32>
      %303 = vector.multi_reduction <add>, %300, %cst_111 [1] : vector<16x32xf32> to vector<16xf32>
      %304 = vector.shape_cast %303 : vector<16xf32> to vector<16x1xf32>
      %cst_112 = arith.constant 3.200000e+01 : f32
      %305 = vector.broadcast %cst_112 : f32 to vector<16x1xf32>
      %306 = arith.divf %304, %305 : vector<16x1xf32>
      %307 = vector.broadcast %306 : vector<16x1xf32> to vector<16x32xf32>
      %308 = arith.subf %300, %307 : vector<16x32xf32>
      %309 = arith.mulf %308, %308 : vector<16x32xf32>
      %cst_113 = arith.constant dense<0.000000e+00> : vector<16xf32>
      %310 = vector.multi_reduction <add>, %309, %cst_113 [1] : vector<16x32xf32> to vector<16xf32>
      %311 = vector.shape_cast %310 : vector<16xf32> to vector<16x1xf32>
      %cst_114 = arith.constant 3.200000e+01 : f32
      %312 = vector.broadcast %cst_114 : f32 to vector<16x1xf32>
      %313 = arith.divf %311, %312 : vector<16x1xf32>
      %cst_115 = arith.constant 9.99999996E-13 : f32
      %314 = vector.broadcast %cst_115 : f32 to vector<16x1xf32>
      %315 = arith.addf %313, %314 : vector<16x1xf32>
      %316 = math.rsqrt %315 : vector<16x1xf32>
      %317 = vector.broadcast %316 : vector<16x1xf32> to vector<16x32xf32>
      %318 = arith.mulf %308, %317 : vector<16x32xf32>
      %319 = vector.broadcast %301 : vector<1x32xf32> to vector<16x32xf32>
      %320 = arith.mulf %318, %319 : vector<16x32xf32>
      %321 = vector.broadcast %302 : vector<1x32xf32> to vector<16x32xf32>
      %322 = arith.addf %320, %321 : vector<16x32xf32>
      %c0_116 = arith.constant 0 : index
      %c0_117 = arith.constant 0 : index
      %323 = vector.load %arg24[%c0_116, %c0_117] : memref<16x32xf32, #tpu.memory_space<vmem>>, vector<16x32xf32>
      tpu.vector_store %arg24[%c0_116, %c0_117], %322 {strides = array<i32>} : memref<16x32xf32, #tpu.memory_space<vmem>>, vector<16x32xf32>,
    } else {
    }
    %c0 = arith.constant 0 : index
    %c0_1 = arith.constant 0 : index
    %3 = vector.load %arg24[%c0, %c0_1] : memref<16x32xf32, #tpu.memory_space<vmem>>, vector<16x32xf32>
    %4 = arith.truncf %3 : vector<16x32xf32> to vector<16x32xbf16>
    %c0_2 = arith.constant 0 : index
    %c0_3 = arith.constant 0 : index
    %c0_4 = arith.constant 0 : index
    %5 = vector.load %arg5[%c0_2, %c0_3, %c0_4] : memref<1x32x96xbf16, #tpu.memory_space<vmem>>, vector<1x32x96xbf16>
    %6 = vector.shape_cast %5 : vector<1x32x96xbf16> to vector<32x96xbf16>
    %cst = arith.constant dense<0.000000e+00> : vector<16x96xf32>
    %7 = tpu.matmul %4, %6, %cst {dimension_numbers = #tpu.dot_dimension_numbers<[1], [0], [0], [1], [0, 0, 1, 1], [], []>} : vector<16x32xbf16>, vector<32x96xbf16>, vector<16x96xf32> -> vector<16x96xf32>
    %c0_5 = arith.constant 0 : index
    %c0_6 = arith.constant 0 : index
    %c0_7 = arith.constant 0 : index
    %8 = vector.load %arg6[%c0_5, %c0_6, %c0_7] : memref<1x1x96xf32, #tpu.memory_space<vmem>>, vector<1x1x96xf32>
    %9 = vector.shape_cast %8 : vector<1x1x96xf32> to vector<1x96xf32>
    %10 = vector.broadcast %9 : vector<1x96xf32> to vector<16x96xf32>
    %11 = arith.addf %7, %10 : vector<16x96xf32>
    %c0_8 = arith.constant 0 : index
    %c0_9 = arith.constant 0 : index
    %12 = vector.load %arg2[%c0_8, %c0_9] : memref<2x8xf32, #tpu.memory_space<vmem>>, vector<1x8xf32>
    %cst_10 = arith.constant 1.000000e+00 : f32
    %13 = vector.broadcast %cst_10 : f32 to vector<1x8xf32>
    %14 = arith.subf %13, %12 : vector<1x8xf32>
    %cst_11 = arith.constant -1.000000e+04 : f32
    %15 = vector.broadcast %cst_11 : f32 to vector<1x8xf32>
    %16 = arith.mulf %14, %15 : vector<1x8xf32>
    %17 = vector.extract_strided_slice %11 {offsets = [0, 0], sizes = [8, 8], strides = [1, 1]} : vector<16x96xf32> to vector<8x8xf32>
    %18 = vector.extract_strided_slice %11 {offsets = [0, 32], sizes = [8, 8], strides = [1, 1]} : vector<16x96xf32> to vector<8x8xf32>
    %19 = vector.extract_strided_slice %11 {offsets = [0, 64], sizes = [8, 8], strides = [1, 1]} : vector<16x96xf32> to vector<8x8xf32>
    %20 = arith.truncf %17 : vector<8x8xf32> to vector<8x8xbf16>
    %21 = arith.truncf %18 : vector<8x8xf32> to vector<8x8xbf16>
    %cst_12 = arith.constant dense<0.000000e+00> : vector<8x8xf32>
    %22 = tpu.matmul %20, %21, %cst_12 {dimension_numbers = #tpu.dot_dimension_numbers<[1], [1], [0], [0], [0, 0, 1, 0], [], []>} : vector<8x8xbf16>, vector<8x8xbf16>, vector<8x8xf32> -> vector<8x8xf32>
    %cst_13 = arith.constant 0.353553385 : f32
    %23 = vector.broadcast %cst_13 : f32 to vector<8x8xf32>
    %24 = arith.mulf %22, %23 : vector<8x8xf32>
    %25 = vector.broadcast %16 : vector<1x8xf32> to vector<8x8xf32>
    %26 = arith.addf %24, %25 : vector<8x8xf32>
    %cst_14 = arith.constant dense<0xFF800000> : vector<8xf32>
    %27 = vector.multi_reduction <maximumf>, %26, %cst_14 [1] : vector<8x8xf32> to vector<8xf32>
    %28 = vector.shape_cast %27 : vector<8xf32> to vector<8x1xf32>
    %29 = vector.broadcast %28 : vector<8x1xf32> to vector<8x8xf32>
    %30 = arith.subf %26, %29 : vector<8x8xf32>
    %31 = math.exp %30 : vector<8x8xf32>
    %cst_15 = arith.constant dense<0.000000e+00> : vector<8xf32>
    %32 = vector.multi_reduction <add>, %31, %cst_15 [1] : vector<8x8xf32> to vector<8xf32>
    %33 = vector.shape_cast %32 : vector<8xf32> to vector<8x1xf32>
    %34 = tpu.reciprocal %33 {approx = true} : vector<8x1xf32> -> vector<8x1xf32>
    %35 = vector.broadcast %34 : vector<8x1xf32> to vector<8x8xf32>
    %36 = arith.mulf %31, %35 : vector<8x8xf32>
    %37 = arith.truncf %36 : vector<8x8xf32> to vector<8x8xbf16>
    %38 = arith.truncf %19 : vector<8x8xf32> to vector<8x8xbf16>
    %cst_16 = arith.constant dense<0.000000e+00> : vector<8x8xf32>
    %39 = tpu.matmul %37, %38, %cst_16 {dimension_numbers = #tpu.dot_dimension_numbers<[1], [0], [0], [1], [0, 0, 1, 1], [], []>} : vector<8x8xbf16>, vector<8x8xbf16>, vector<8x8xf32> -> vector<8x8xf32>
    %40 = vector.extract_strided_slice %11 {offsets = [0, 8], sizes = [8, 8], strides = [1, 1]} : vector<16x96xf32> to vector<8x8xf32>
    %41 = vector.extract_strided_slice %11 {offsets = [0, 40], sizes = [8, 8], strides = [1, 1]} : vector<16x96xf32> to vector<8x8xf32>
    %42 = vector.extract_strided_slice %11 {offsets = [0, 72], sizes = [8, 8], strides = [1, 1]} : vector<16x96xf32> to vector<8x8xf32>
    %43 = arith.truncf %40 : vector<8x8xf32> to vector<8x8xbf16>
    %44 = arith.truncf %41 : vector<8x8xf32> to vector<8x8xbf16>
    %cst_17 = arith.constant dense<0.000000e+00> : vector<8x8xf32>
    %45 = tpu.matmul %43, %44, %cst_17 {dimension_numbers = #tpu.dot_dimension_numbers<[1], [1], [0], [0], [0, 0, 1, 0], [], []>} : vector<8x8xbf16>, vector<8x8xbf16>, vector<8x8xf32> -> vector<8x8xf32>
    %cst_18 = arith.constant 0.353553385 : f32
    %46 = vector.broadcast %cst_18 : f32 to vector<8x8xf32>
    %47 = arith.mulf %45, %46 : vector<8x8xf32>
    %48 = vector.broadcast %16 : vector<1x8xf32> to vector<8x8xf32>
    %49 = arith.addf %47, %48 : vector<8x8xf32>
    %cst_19 = arith.constant dense<0xFF800000> : vector<8xf32>
    %50 = vector.multi_reduction <maximumf>, %49, %cst_19 [1] : vector<8x8xf32> to vector<8xf32>
    %51 = vector.shape_cast %50 : vector<8xf32> to vector<8x1xf32>
    %52 = vector.broadcast %51 : vector<8x1xf32> to vector<8x8xf32>
    %53 = arith.subf %49, %52 : vector<8x8xf32>
    %54 = math.exp %53 : vector<8x8xf32>
    %cst_20 = arith.constant dense<0.000000e+00> : vector<8xf32>
    %55 = vector.multi_reduction <add>, %54, %cst_20 [1] : vector<8x8xf32> to vector<8xf32>
    %56 = vector.shape_cast %55 : vector<8xf32> to vector<8x1xf32>
    %57 = tpu.reciprocal %56 {approx = true} : vector<8x1xf32> -> vector<8x1xf32>
    %58 = vector.broadcast %57 : vector<8x1xf32> to vector<8x8xf32>
    %59 = arith.mulf %54, %58 : vector<8x8xf32>
    %60 = arith.truncf %59 : vector<8x8xf32> to vector<8x8xbf16>
    %61 = arith.truncf %42 : vector<8x8xf32> to vector<8x8xbf16>
    %cst_21 = arith.constant dense<0.000000e+00> : vector<8x8xf32>
    %62 = tpu.matmul %60, %61, %cst_21 {dimension_numbers = #tpu.dot_dimension_numbers<[1], [0], [0], [1], [0, 0, 1, 1], [], []>} : vector<8x8xbf16>, vector<8x8xbf16>, vector<8x8xf32> -> vector<8x8xf32>
    %63 = vector.extract_strided_slice %11 {offsets = [0, 16], sizes = [8, 8], strides = [1, 1]} : vector<16x96xf32> to vector<8x8xf32>
    %64 = vector.extract_strided_slice %11 {offsets = [0, 48], sizes = [8, 8], strides = [1, 1]} : vector<16x96xf32> to vector<8x8xf32>
    %65 = vector.extract_strided_slice %11 {offsets = [0, 80], sizes = [8, 8], strides = [1, 1]} : vector<16x96xf32> to vector<8x8xf32>
    %66 = arith.truncf %63 : vector<8x8xf32> to vector<8x8xbf16>
    %67 = arith.truncf %64 : vector<8x8xf32> to vector<8x8xbf16>
    %cst_22 = arith.constant dense<0.000000e+00> : vector<8x8xf32>
    %68 = tpu.matmul %66, %67, %cst_22 {dimension_numbers = #tpu.dot_dimension_numbers<[1], [1], [0], [0], [0, 0, 1, 0], [], []>} : vector<8x8xbf16>, vector<8x8xbf16>, vector<8x8xf32> -> vector<8x8xf32>
    %cst_23 = arith.constant 0.353553385 : f32
    %69 = vector.broadcast %cst_23 : f32 to vector<8x8xf32>
    %70 = arith.mulf %68, %69 : vector<8x8xf32>
    %71 = vector.broadcast %16 : vector<1x8xf32> to vector<8x8xf32>
    %72 = arith.addf %70, %71 : vector<8x8xf32>
    %cst_24 = arith.constant dense<0xFF800000> : vector<8xf32>
    %73 = vector.multi_reduction <maximumf>, %72, %cst_24 [1] : vector<8x8xf32> to vector<8xf32>
    %74 = vector.shape_cast %73 : vector<8xf32> to vector<8x1xf32>
    %75 = vector.broadcast %74 : vector<8x1xf32> to vector<8x8xf32>
    %76 = arith.subf %72, %75 : vector<8x8xf32>
    %77 = math.exp %76 : vector<8x8xf32>
    %cst_25 = arith.constant dense<0.000000e+00> : vector<8xf32>
    %78 = vector.multi_reduction <add>, %77, %cst_25 [1] : vector<8x8xf32> to vector<8xf32>
    %79 = vector.shape_cast %78 : vector<8xf32> to vector<8x1xf32>
    %80 = tpu.reciprocal %79 {approx = true} : vector<8x1xf32> -> vector<8x1xf32>
    %81 = vector.broadcast %80 : vector<8x1xf32> to vector<8x8xf32>
    %82 = arith.mulf %77, %81 : vector<8x8xf32>
    %83 = arith.truncf %82 : vector<8x8xf32> to vector<8x8xbf16>
    %84 = arith.truncf %65 : vector<8x8xf32> to vector<8x8xbf16>
    %cst_26 = arith.constant dense<0.000000e+00> : vector<8x8xf32>
    %85 = tpu.matmul %83, %84, %cst_26 {dimension_numbers = #tpu.dot_dimension_numbers<[1], [0], [0], [1], [0, 0, 1, 1], [], []>} : vector<8x8xbf16>, vector<8x8xbf16>, vector<8x8xf32> -> vector<8x8xf32>
    %86 = vector.extract_strided_slice %11 {offsets = [0, 24], sizes = [8, 8], strides = [1, 1]} : vector<16x96xf32> to vector<8x8xf32>
    %87 = vector.extract_strided_slice %11 {offsets = [0, 56], sizes = [8, 8], strides = [1, 1]} : vector<16x96xf32> to vector<8x8xf32>
    %88 = vector.extract_strided_slice %11 {offsets = [0, 88], sizes = [8, 8], strides = [1, 1]} : vector<16x96xf32> to vector<8x8xf32>
    %89 = arith.truncf %86 : vector<8x8xf32> to vector<8x8xbf16>
    %90 = arith.truncf %87 : vector<8x8xf32> to vector<8x8xbf16>
    %cst_27 = arith.constant dense<0.000000e+00> : vector<8x8xf32>
    %91 = tpu.matmul %89, %90, %cst_27 {dimension_numbers = #tpu.dot_dimension_numbers<[1], [1], [0], [0], [0, 0, 1, 0], [], []>} : vector<8x8xbf16>, vector<8x8xbf16>, vector<8x8xf32> -> vector<8x8xf32>
    %cst_28 = arith.constant 0.353553385 : f32
    %92 = vector.broadcast %cst_28 : f32 to vector<8x8xf32>
    %93 = arith.mulf %91, %92 : vector<8x8xf32>
    %94 = vector.broadcast %16 : vector<1x8xf32> to vector<8x8xf32>
    %95 = arith.addf %93, %94 : vector<8x8xf32>
    %cst_29 = arith.constant dense<0xFF800000> : vector<8xf32>
    %96 = vector.multi_reduction <maximumf>, %95, %cst_29 [1] : vector<8x8xf32> to vector<8xf32>
    %97 = vector.shape_cast %96 : vector<8xf32> to vector<8x1xf32>
    %98 = vector.broadcast %97 : vector<8x1xf32> to vector<8x8xf32>
    %99 = arith.subf %95, %98 : vector<8x8xf32>
    %100 = math.exp %99 : vector<8x8xf32>
    %cst_30 = arith.constant dense<0.000000e+00> : vector<8xf32>
    %101 = vector.multi_reduction <add>, %100, %cst_30 [1] : vector<8x8xf32> to vector<8xf32>
    %102 = vector.shape_cast %101 : vector<8xf32> to vector<8x1xf32>
    %103 = tpu.reciprocal %102 {approx = true} : vector<8x1xf32> -> vector<8x1xf32>
    %104 = vector.broadcast %103 : vector<8x1xf32> to vector<8x8xf32>
    %105 = arith.mulf %100, %104 : vector<8x8xf32>
    %106 = arith.truncf %105 : vector<8x8xf32> to vector<8x8xbf16>
    %107 = arith.truncf %88 : vector<8x8xf32> to vector<8x8xbf16>
    %cst_31 = arith.constant dense<0.000000e+00> : vector<8x8xf32>
    %108 = tpu.matmul %106, %107, %cst_31 {dimension_numbers = #tpu.dot_dimension_numbers<[1], [0], [0], [1], [0, 0, 1, 1], [], []>} : vector<8x8xbf16>, vector<8x8xbf16>, vector<8x8xf32> -> vector<8x8xf32>
    %109 = tpu.concatenate %39, %62, %85, %108 in 1 : vector<8x8xf32>, vector<8x8xf32>, vector<8x8xf32>, vector<8x8xf32> -> vector<8x32xf32>
    %c1 = arith.constant 1 : index
    %c0_32 = arith.constant 0 : index
    %110 = vector.load %arg2[%c1, %c0_32] : memref<2x8xf32, #tpu.memory_space<vmem>>, vector<1x8xf32>
    %cst_33 = arith.constant 1.000000e+00 : f32
    %111 = vector.broadcast %cst_33 : f32 to vector<1x8xf32>
    %112 = arith.subf %111, %110 : vector<1x8xf32>
    %cst_34 = arith.constant -1.000000e+04 : f32
    %113 = vector.broadcast %cst_34 : f32 to vector<1x8xf32>
    %114 = arith.mulf %112, %113 : vector<1x8xf32>
    %115 = vector.extract_strided_slice %11 {offsets = [8, 0], sizes = [8, 8], strides = [1, 1]} : vector<16x96xf32> to vector<8x8xf32>
    %116 = vector.extract_strided_slice %11 {offsets = [8, 32], sizes = [8, 8], strides = [1, 1]} : vector<16x96xf32> to vector<8x8xf32>
    %117 = vector.extract_strided_slice %11 {offsets = [8, 64], sizes = [8, 8], strides = [1, 1]} : vector<16x96xf32> to vector<8x8xf32>
    %118 = arith.truncf %115 : vector<8x8xf32> to vector<8x8xbf16>
    %119 = arith.truncf %116 : vector<8x8xf32> to vector<8x8xbf16>
    %cst_35 = arith.constant dense<0.000000e+00> : vector<8x8xf32>
    %120 = tpu.matmul %118, %119, %cst_35 {dimension_numbers = #tpu.dot_dimension_numbers<[1], [1], [0], [0], [0, 0, 1, 0], [], []>} : vector<8x8xbf16>, vector<8x8xbf16>, vector<8x8xf32> -> vector<8x8xf32>
    %cst_36 = arith.constant 0.353553385 : f32
    %121 = vector.broadcast %cst_36 : f32 to vector<8x8xf32>
    %122 = arith.mulf %120, %121 : vector<8x8xf32>
    %123 = vector.broadcast %114 : vector<1x8xf32> to vector<8x8xf32>
    %124 = arith.addf %122, %123 : vector<8x8xf32>
    %cst_37 = arith.constant dense<0xFF800000> : vector<8xf32>
    %125 = vector.multi_reduction <maximumf>, %124, %cst_37 [1] : vector<8x8xf32> to vector<8xf32>
    %126 = vector.shape_cast %125 : vector<8xf32> to vector<8x1xf32>
    %127 = vector.broadcast %126 : vector<8x1xf32> to vector<8x8xf32>
    %128 = arith.subf %124, %127 : vector<8x8xf32>
    %129 = math.exp %128 : vector<8x8xf32>
    %cst_38 = arith.constant dense<0.000000e+00> : vector<8xf32>
    %130 = vector.multi_reduction <add>, %129, %cst_38 [1] : vector<8x8xf32> to vector<8xf32>
    %131 = vector.shape_cast %130 : vector<8xf32> to vector<8x1xf32>
    %132 = tpu.reciprocal %131 {approx = true} : vector<8x1xf32> -> vector<8x1xf32>
    %133 = vector.broadcast %132 : vector<8x1xf32> to vector<8x8xf32>
    %134 = arith.mulf %129, %133 : vector<8x8xf32>
    %135 = arith.truncf %134 : vector<8x8xf32> to vector<8x8xbf16>
    %136 = arith.truncf %117 : vector<8x8xf32> to vector<8x8xbf16>
    %cst_39 = arith.constant dense<0.000000e+00> : vector<8x8xf32>
    %137 = tpu.matmul %135, %136, %cst_39 {dimension_numbers = #tpu.dot_dimension_numbers<[1], [0], [0], [1], [0, 0, 1, 1], [], []>} : vector<8x8xbf16>, vector<8x8xbf16>, vector<8x8xf32> -> vector<8x8xf32>
    %138 = vector.extract_strided_slice %11 {offsets = [8, 8], sizes = [8, 8], strides = [1, 1]} : vector<16x96xf32> to vector<8x8xf32>
    %139 = vector.extract_strided_slice %11 {offsets = [8, 40], sizes = [8, 8], strides = [1, 1]} : vector<16x96xf32> to vector<8x8xf32>
    %140 = vector.extract_strided_slice %11 {offsets = [8, 72], sizes = [8, 8], strides = [1, 1]} : vector<16x96xf32> to vector<8x8xf32>
    %141 = arith.truncf %138 : vector<8x8xf32> to vector<8x8xbf16>
    %142 = arith.truncf %139 : vector<8x8xf32> to vector<8x8xbf16>
    %cst_40 = arith.constant dense<0.000000e+00> : vector<8x8xf32>
    %143 = tpu.matmul %141, %142, %cst_40 {dimension_numbers = #tpu.dot_dimension_numbers<[1], [1], [0], [0], [0, 0, 1, 0], [], []>} : vector<8x8xbf16>, vector<8x8xbf16>, vector<8x8xf32> -> vector<8x8xf32>
    %cst_41 = arith.constant 0.353553385 : f32
    %144 = vector.broadcast %cst_41 : f32 to vector<8x8xf32>
    %145 = arith.mulf %143, %144 : vector<8x8xf32>
    %146 = vector.broadcast %114 : vector<1x8xf32> to vector<8x8xf32>
    %147 = arith.addf %145, %146 : vector<8x8xf32>
    %cst_42 = arith.constant dense<0xFF800000> : vector<8xf32>
    %148 = vector.multi_reduction <maximumf>, %147, %cst_42 [1] : vector<8x8xf32> to vector<8xf32>
    %149 = vector.shape_cast %148 : vector<8xf32> to vector<8x1xf32>
    %150 = vector.broadcast %149 : vector<8x1xf32> to vector<8x8xf32>
    %151 = arith.subf %147, %150 : vector<8x8xf32>
    %152 = math.exp %151 : vector<8x8xf32>
    %cst_43 = arith.constant dense<0.000000e+00> : vector<8xf32>
    %153 = vector.multi_reduction <add>, %152, %cst_43 [1] : vector<8x8xf32> to vector<8xf32>
    %154 = vector.shape_cast %153 : vector<8xf32> to vector<8x1xf32>
    %155 = tpu.reciprocal %154 {approx = true} : vector<8x1xf32> -> vector<8x1xf32>
    %156 = vector.broadcast %155 : vector<8x1xf32> to vector<8x8xf32>
    %157 = arith.mulf %152, %156 : vector<8x8xf32>
    %158 = arith.truncf %157 : vector<8x8xf32> to vector<8x8xbf16>
    %159 = arith.truncf %140 : vector<8x8xf32> to vector<8x8xbf16>
    %cst_44 = arith.constant dense<0.000000e+00> : vector<8x8xf32>
    %160 = tpu.matmul %158, %159, %cst_44 {dimension_numbers = #tpu.dot_dimension_numbers<[1], [0], [0], [1], [0, 0, 1, 1], [], []>} : vector<8x8xbf16>, vector<8x8xbf16>, vector<8x8xf32> -> vector<8x8xf32>
    %161 = vector.extract_strided_slice %11 {offsets = [8, 16], sizes = [8, 8], strides = [1, 1]} : vector<16x96xf32> to vector<8x8xf32>
    %162 = vector.extract_strided_slice %11 {offsets = [8, 48], sizes = [8, 8], strides = [1, 1]} : vector<16x96xf32> to vector<8x8xf32>
    %163 = vector.extract_strided_slice %11 {offsets = [8, 80], sizes = [8, 8], strides = [1, 1]} : vector<16x96xf32> to vector<8x8xf32>
    %164 = arith.truncf %161 : vector<8x8xf32> to vector<8x8xbf16>
    %165 = arith.truncf %162 : vector<8x8xf32> to vector<8x8xbf16>
    %cst_45 = arith.constant dense<0.000000e+00> : vector<8x8xf32>
    %166 = tpu.matmul %164, %165, %cst_45 {dimension_numbers = #tpu.dot_dimension_numbers<[1], [1], [0], [0], [0, 0, 1, 0], [], []>} : vector<8x8xbf16>, vector<8x8xbf16>, vector<8x8xf32> -> vector<8x8xf32>
    %cst_46 = arith.constant 0.353553385 : f32
    %167 = vector.broadcast %cst_46 : f32 to vector<8x8xf32>
    %168 = arith.mulf %166, %167 : vector<8x8xf32>
    %169 = vector.broadcast %114 : vector<1x8xf32> to vector<8x8xf32>
    %170 = arith.addf %168, %169 : vector<8x8xf32>
    %cst_47 = arith.constant dense<0xFF800000> : vector<8xf32>
    %171 = vector.multi_reduction <maximumf>, %170, %cst_47 [1] : vector<8x8xf32> to vector<8xf32>
    %172 = vector.shape_cast %171 : vector<8xf32> to vector<8x1xf32>
    %173 = vector.broadcast %172 : vector<8x1xf32> to vector<8x8xf32>
    %174 = arith.subf %170, %173 : vector<8x8xf32>
    %175 = math.exp %174 : vector<8x8xf32>
    %cst_48 = arith.constant dense<0.000000e+00> : vector<8xf32>
    %176 = vector.multi_reduction <add>, %175, %cst_48 [1] : vector<8x8xf32> to vector<8xf32>
    %177 = vector.shape_cast %176 : vector<8xf32> to vector<8x1xf32>
    %178 = tpu.reciprocal %177 {approx = true} : vector<8x1xf32> -> vector<8x1xf32>
    %179 = vector.broadcast %178 : vector<8x1xf32> to vector<8x8xf32>
    %180 = arith.mulf %175, %179 : vector<8x8xf32>
    %181 = arith.truncf %180 : vector<8x8xf32> to vector<8x8xbf16>
    %182 = arith.truncf %163 : vector<8x8xf32> to vector<8x8xbf16>
    %cst_49 = arith.constant dense<0.000000e+00> : vector<8x8xf32>
    %183 = tpu.matmul %181, %182, %cst_49 {dimension_numbers = #tpu.dot_dimension_numbers<[1], [0], [0], [1], [0, 0, 1, 1], [], []>} : vector<8x8xbf16>, vector<8x8xbf16>, vector<8x8xf32> -> vector<8x8xf32>
    %184 = vector.extract_strided_slice %11 {offsets = [8, 24], sizes = [8, 8], strides = [1, 1]} : vector<16x96xf32> to vector<8x8xf32>
    %185 = vector.extract_strided_slice %11 {offsets = [8, 56], sizes = [8, 8], strides = [1, 1]} : vector<16x96xf32> to vector<8x8xf32>
    %186 = vector.extract_strided_slice %11 {offsets = [8, 88], sizes = [8, 8], strides = [1, 1]} : vector<16x96xf32> to vector<8x8xf32>
    %187 = arith.truncf %184 : vector<8x8xf32> to vector<8x8xbf16>
    %188 = arith.truncf %185 : vector<8x8xf32> to vector<8x8xbf16>
    %cst_50 = arith.constant dense<0.000000e+00> : vector<8x8xf32>
    %189 = tpu.matmul %187, %188, %cst_50 {dimension_numbers = #tpu.dot_dimension_numbers<[1], [1], [0], [0], [0, 0, 1, 0], [], []>} : vector<8x8xbf16>, vector<8x8xbf16>, vector<8x8xf32> -> vector<8x8xf32>
    %cst_51 = arith.constant 0.353553385 : f32
    %190 = vector.broadcast %cst_51 : f32 to vector<8x8xf32>
    %191 = arith.mulf %189, %190 : vector<8x8xf32>
    %192 = vector.broadcast %114 : vector<1x8xf32> to vector<8x8xf32>
    %193 = arith.addf %191, %192 : vector<8x8xf32>
    %cst_52 = arith.constant dense<0xFF800000> : vector<8xf32>
    %194 = vector.multi_reduction <maximumf>, %193, %cst_52 [1] : vector<8x8xf32> to vector<8xf32>
    %195 = vector.shape_cast %194 : vector<8xf32> to vector<8x1xf32>
    %196 = vector.broadcast %195 : vector<8x1xf32> to vector<8x8xf32>
    %197 = arith.subf %193, %196 : vector<8x8xf32>
    %198 = math.exp %197 : vector<8x8xf32>
    %cst_53 = arith.constant dense<0.000000e+00> : vector<8xf32>
    %199 = vector.multi_reduction <add>, %198, %cst_53 [1] : vector<8x8xf32> to vector<8xf32>
    %200 = vector.shape_cast %199 : vector<8xf32> to vector<8x1xf32>
    %201 = tpu.reciprocal %200 {approx = true} : vector<8x1xf32> -> vector<8x1xf32>
    %202 = vector.broadcast %201 : vector<8x1xf32> to vector<8x8xf32>
    %203 = arith.mulf %198, %202 : vector<8x8xf32>
    %204 = arith.truncf %203 : vector<8x8xf32> to vector<8x8xbf16>
    %205 = arith.truncf %186 : vector<8x8xf32> to vector<8x8xbf16>
    %cst_54 = arith.constant dense<0.000000e+00> : vector<8x8xf32>
    %206 = tpu.matmul %204, %205, %cst_54 {dimension_numbers = #tpu.dot_dimension_numbers<[1], [0], [0], [1], [0, 0, 1, 1], [], []>} : vector<8x8xbf16>, vector<8x8xbf16>, vector<8x8xf32> -> vector<8x8xf32>
    %207 = tpu.concatenate %137, %160, %183, %206 in 1 : vector<8x8xf32>, vector<8x8xf32>, vector<8x8xf32>, vector<8x8xf32> -> vector<8x32xf32>
    %208 = tpu.concatenate %109, %207 in 0 : vector<8x32xf32>, vector<8x32xf32> -> vector<16x32xf32>
    %209 = arith.truncf %208 : vector<16x32xf32> to vector<16x32xbf16>
    %c0_55 = arith.constant 0 : index
    %c0_56 = arith.constant 0 : index
    %c0_57 = arith.constant 0 : index
    %210 = vector.load %arg7[%c0_55, %c0_56, %c0_57] : memref<1x32x32xbf16, #tpu.memory_space<vmem>>, vector<1x32x32xbf16>
    %211 = vector.shape_cast %210 : vector<1x32x32xbf16> to vector<32x32xbf16>
    %cst_58 = arith.constant dense<0.000000e+00> : vector<16x32xf32>
    %212 = tpu.matmul %209, %211, %cst_58 {dimension_numbers = #tpu.dot_dimension_numbers<[1], [0], [0], [1], [0, 0, 1, 1], [], []>} : vector<16x32xbf16>, vector<32x32xbf16>, vector<16x32xf32> -> vector<16x32xf32>
    %c0_59 = arith.constant 0 : index
    %c0_60 = arith.constant 0 : index
    %c0_61 = arith.constant 0 : index
    %213 = vector.load %arg8[%c0_59, %c0_60, %c0_61] : memref<1x1x32xf32, #tpu.memory_space<vmem>>, vector<1x1x32xf32>
    %214 = vector.shape_cast %213 : vector<1x1x32xf32> to vector<1x32xf32>
    %215 = vector.broadcast %214 : vector<1x32xf32> to vector<16x32xf32>
    %216 = arith.addf %212, %215 : vector<16x32xf32>
    %217 = arith.addf %216, %3 : vector<16x32xf32>
    %c0_62 = arith.constant 0 : index
    %c0_63 = arith.constant 0 : index
    %c0_64 = arith.constant 0 : index
    %218 = vector.load %arg9[%c0_62, %c0_63, %c0_64] : memref<1x1x32xf32, #tpu.memory_space<vmem>>, vector<1x1x32xf32>
    %219 = vector.shape_cast %218 : vector<1x1x32xf32> to vector<1x32xf32>
    %c0_65 = arith.constant 0 : index
    %c0_66 = arith.constant 0 : index
    %c0_67 = arith.constant 0 : index
    %220 = vector.load %arg10[%c0_65, %c0_66, %c0_67] : memref<1x1x32xf32, #tpu.memory_space<vmem>>, vector<1x1x32xf32>
    %221 = vector.shape_cast %220 : vector<1x1x32xf32> to vector<1x32xf32>
    %cst_68 = arith.constant dense<0.000000e+00> : vector<16xf32>
    %222 = vector.multi_reduction <add>, %217, %cst_68 [1] : vector<16x32xf32> to vector<16xf32>
    %223 = vector.shape_cast %222 : vector<16xf32> to vector<16x1xf32>
    %cst_69 = arith.constant 3.200000e+01 : f32
    %224 = vector.broadcast %cst_69 : f32 to vector<16x1xf32>
    %225 = arith.divf %223, %224 : vector<16x1xf32>
    %226 = vector.broadcast %225 : vector<16x1xf32> to vector<16x32xf32>
    %227 = arith.subf %217, %226 : vector<16x32xf32>
    %228 = arith.mulf %227, %227 : vector<16x32xf32>
    %cst_70 = arith.constant dense<0.000000e+00> : vector<16xf32>
    %229 = vector.multi_reduction <add>, %228, %cst_70 [1] : vector<16x32xf32> to vector<16xf32>
    %230 = vector.shape_cast %229 : vector<16xf32> to vector<16x1xf32>
    %cst_71 = arith.constant 3.200000e+01 : f32
    %231 = vector.broadcast %cst_71 : f32 to vector<16x1xf32>
    %232 = arith.divf %230, %231 : vector<16x1xf32>
    %cst_72 = arith.constant 9.99999996E-13 : f32
    %233 = vector.broadcast %cst_72 : f32 to vector<16x1xf32>
    %234 = arith.addf %232, %233 : vector<16x1xf32>
    %235 = math.rsqrt %234 : vector<16x1xf32>
    %236 = vector.broadcast %235 : vector<16x1xf32> to vector<16x32xf32>
    %237 = arith.mulf %227, %236 : vector<16x32xf32>
    %238 = vector.broadcast %219 : vector<1x32xf32> to vector<16x32xf32>
    %239 = arith.mulf %237, %238 : vector<16x32xf32>
    %240 = vector.broadcast %221 : vector<1x32xf32> to vector<16x32xf32>
    %241 = arith.addf %239, %240 : vector<16x32xf32>
    %242 = arith.truncf %241 : vector<16x32xf32> to vector<16x32xbf16>
    %c0_73 = arith.constant 0 : index
    %c0_74 = arith.constant 0 : index
    %c0_75 = arith.constant 0 : index
    %243 = vector.load %arg11[%c0_73, %c0_74, %c0_75] : memref<1x32x64xbf16, #tpu.memory_space<vmem>>, vector<1x32x64xbf16>
    %244 = vector.shape_cast %243 : vector<1x32x64xbf16> to vector<32x64xbf16>
    %cst_76 = arith.constant dense<0.000000e+00> : vector<16x64xf32>
    %245 = tpu.matmul %242, %244, %cst_76 {dimension_numbers = #tpu.dot_dimension_numbers<[1], [0], [0], [1], [0, 0, 1, 1], [], []>} : vector<16x32xbf16>, vector<32x64xbf16>, vector<16x64xf32> -> vector<16x64xf32>
    %c0_77 = arith.constant 0 : index
    %c0_78 = arith.constant 0 : index
    %c0_79 = arith.constant 0 : index
    %246 = vector.load %arg12[%c0_77, %c0_78, %c0_79] : memref<1x1x64xf32, #tpu.memory_space<vmem>>, vector<1x1x64xf32>
    %247 = vector.shape_cast %246 : vector<1x1x64xf32> to vector<1x64xf32>
    %248 = vector.broadcast %247 : vector<1x64xf32> to vector<16x64xf32>
    %249 = arith.addf %245, %248 : vector<16x64xf32>
    %cst_80 = arith.constant 5.000000e-01 : f32
    %250 = vector.broadcast %cst_80 : f32 to vector<16x64xf32>
    %251 = arith.mulf %250, %249 : vector<16x64xf32>
    %cst_81 = arith.constant 4.471500e-02 : f32
    %252 = vector.broadcast %cst_81 : f32 to vector<16x64xf32>
    %253 = arith.mulf %252, %249 : vector<16x64xf32>
    %254 = arith.mulf %253, %249 : vector<16x64xf32>
    %255 = arith.mulf %254, %249 : vector<16x64xf32>
    %256 = arith.addf %249, %255 : vector<16x64xf32>
    %cst_82 = arith.constant 0.797884583 : f32
    %257 = vector.broadcast %cst_82 : f32 to vector<16x64xf32>
    %258 = arith.mulf %257, %256 : vector<16x64xf32>
    %259 = math.tanh %258 : vector<16x64xf32>
    %cst_83 = arith.constant 1.000000e+00 : f32
    %260 = vector.broadcast %cst_83 : f32 to vector<16x64xf32>
    %261 = arith.addf %260, %259 : vector<16x64xf32>
    %262 = arith.mulf %251, %261 : vector<16x64xf32>
    %263 = arith.truncf %262 : vector<16x64xf32> to vector<16x64xbf16>
    %c0_84 = arith.constant 0 : index
    %c0_85 = arith.constant 0 : index
    %c0_86 = arith.constant 0 : index
    %264 = vector.load %arg13[%c0_84, %c0_85, %c0_86] : memref<1x64x32xbf16, #tpu.memory_space<vmem>>, vector<1x64x32xbf16>
    %265 = vector.shape_cast %264 : vector<1x64x32xbf16> to vector<64x32xbf16>
    %cst_87 = arith.constant dense<0.000000e+00> : vector<16x32xf32>
    %266 = tpu.matmul %263, %265, %cst_87 {dimension_numbers = #tpu.dot_dimension_numbers<[1], [0], [0], [1], [0, 0, 1, 1], [], []>} : vector<16x64xbf16>, vector<64x32xbf16>, vector<16x32xf32> -> vector<16x32xf32>
    %c0_88 = arith.constant 0 : index
    %c0_89 = arith.constant 0 : index
    %c0_90 = arith.constant 0 : index
    %267 = vector.load %arg14[%c0_88, %c0_89, %c0_90] : memref<1x1x32xf32, #tpu.memory_space<vmem>>, vector<1x1x32xf32>
    %268 = vector.shape_cast %267 : vector<1x1x32xf32> to vector<1x32xf32>
    %269 = vector.broadcast %268 : vector<1x32xf32> to vector<16x32xf32>
    %270 = arith.addf %266, %269 : vector<16x32xf32>
    %271 = arith.addf %270, %241 : vector<16x32xf32>
    %c0_91 = arith.constant 0 : index
    %c0_92 = arith.constant 0 : index
    %c0_93 = arith.constant 0 : index
    %272 = vector.load %arg15[%c0_91, %c0_92, %c0_93] : memref<1x1x32xf32, #tpu.memory_space<vmem>>, vector<1x1x32xf32>
    %273 = vector.shape_cast %272 : vector<1x1x32xf32> to vector<1x32xf32>
    %c0_94 = arith.constant 0 : index
    %c0_95 = arith.constant 0 : index
    %c0_96 = arith.constant 0 : index
    %274 = vector.load %arg16[%c0_94, %c0_95, %c0_96] : memref<1x1x32xf32, #tpu.memory_space<vmem>>, vector<1x1x32xf32>
    %275 = vector.shape_cast %274 : vector<1x1x32xf32> to vector<1x32xf32>
    %cst_97 = arith.constant dense<0.000000e+00> : vector<16xf32>
    %276 = vector.multi_reduction <add>, %271, %cst_97 [1] : vector<16x32xf32> to vector<16xf32>
    %277 = vector.shape_cast %276 : vector<16xf32> to vector<16x1xf32>
    %cst_98 = arith.constant 3.200000e+01 : f32
    %278 = vector.broadcast %cst_98 : f32 to vector<16x1xf32>
    %279 = arith.divf %277, %278 : vector<16x1xf32>
    %280 = vector.broadcast %279 : vector<16x1xf32> to vector<16x32xf32>
    %281 = arith.subf %271, %280 : vector<16x32xf32>
    %282 = arith.mulf %281, %281 : vector<16x32xf32>
    %cst_99 = arith.constant dense<0.000000e+00> : vector<16xf32>
    %283 = vector.multi_reduction <add>, %282, %cst_99 [1] : vector<16x32xf32> to vector<16xf32>
    %284 = vector.shape_cast %283 : vector<16xf32> to vector<16x1xf32>
    %cst_100 = arith.constant 3.200000e+01 : f32
    %285 = vector.broadcast %cst_100 : f32 to vector<16x1xf32>
    %286 = arith.divf %284, %285 : vector<16x1xf32>
    %cst_101 = arith.constant 9.99999996E-13 : f32
    %287 = vector.broadcast %cst_101 : f32 to vector<16x1xf32>
    %288 = arith.addf %286, %287 : vector<16x1xf32>
    %289 = math.rsqrt %288 : vector<16x1xf32>
    %290 = vector.broadcast %289 : vector<16x1xf32> to vector<16x32xf32>
    %291 = arith.mulf %281, %290 : vector<16x32xf32>
    %292 = vector.broadcast %273 : vector<1x32xf32> to vector<16x32xf32>
    %293 = arith.mulf %291, %292 : vector<16x32xf32>
    %294 = vector.broadcast %275 : vector<1x32xf32> to vector<16x32xf32>
    %295 = arith.addf %293, %294 : vector<16x32xf32>
    %c0_102 = arith.constant 0 : index
    %c0_103 = arith.constant 0 : index
    %296 = vector.load %arg24[%c0_102, %c0_103] : memref<16x32xf32, #tpu.memory_space<vmem>>, vector<16x32xf32>
    tpu.vector_store %arg24[%c0_102, %c0_103], %295 {strides = array<i32>} : memref<16x32xf32, #tpu.memory_space<vmem>>, vector<16x32xf32>,
    %c1_i32 = arith.constant 1 : i32
    %297 = arith.cmpi eq, %arg0, %c1_i32 : i32
    %298 = arith.extui %297 : i1 to i32
    %c0_i32_104 = arith.constant 0 : i32
    %299 = arith.cmpi ne, %298, %c0_i32_104 : i32
    scf.if %299 {
      %300 = vector.extract_strided_slice %295 {offsets = [0, 0], sizes = [1, 32], strides = [1, 1]} : vector<16x32xf32> to vector<1x32xf32>
      %301 = vector.extract_strided_slice %295 {offsets = [8, 0], sizes = [1, 32], strides = [1, 1]} : vector<16x32xf32> to vector<1x32xf32>
      %302 = tpu.concatenate %300, %301 in 0 : vector<1x32xf32>, vector<1x32xf32> -> vector<2x32xf32>
      %303 = arith.truncf %302 : vector<2x32xf32> to vector<2x32xbf16>
      %c0_105 = arith.constant 0 : index
      %c0_106 = arith.constant 0 : index
      %304 = vector.load %arg17[%c0_105, %c0_106] : memref<32x16xbf16, #tpu.memory_space<vmem>>, vector<32x16xbf16>
      %cst_107 = arith.constant dense<0.000000e+00> : vector<2x16xf32>
      %305 = tpu.matmul %303, %304, %cst_107 {dimension_numbers = #tpu.dot_dimension_numbers<[1], [0], [0], [1], [0, 0, 1, 1], [], []>} : vector<2x32xbf16>, vector<32x16xbf16>, vector<2x16xf32> -> vector<2x16xf32>
      %c0_108 = arith.constant 0 : index
      %c0_109 = arith.constant 0 : index
      %306 = vector.load %arg18[%c0_108, %c0_109] : memref<1x16xf32, #tpu.memory_space<vmem>>, vector<1x16xf32>
      %307 = vector.broadcast %306 : vector<1x16xf32> to vector<2x16xf32>
      %308 = arith.addf %305, %307 : vector<2x16xf32>
      %cst_110 = arith.constant 0.000000e+00 : f32
      %309 = vector.broadcast %cst_110 : f32 to vector<2x16xf32>
      %310 = arith.maximumf %308, %309 : vector<2x16xf32>
      %311 = arith.truncf %310 : vector<2x16xf32> to vector<2x16xbf16>
      %c0_111 = arith.constant 0 : index
      %c0_112 = arith.constant 0 : index
      %312 = vector.load %arg19[%c0_111, %c0_112] : memref<16x16xbf16, #tpu.memory_space<vmem>>, vector<16x16xbf16>
      %cst_113 = arith.constant dense<0.000000e+00> : vector<2x16xf32>
      %313 = tpu.matmul %311, %312, %cst_113 {dimension_numbers = #tpu.dot_dimension_numbers<[1], [0], [0], [1], [0, 0, 1, 1], [], []>} : vector<2x16xbf16>, vector<16x16xbf16>, vector<2x16xf32> -> vector<2x16xf32>
      %c0_114 = arith.constant 0 : index
      %c0_115 = arith.constant 0 : index
      %314 = vector.load %arg20[%c0_114, %c0_115] : memref<1x16xf32, #tpu.memory_space<vmem>>, vector<1x16xf32>
      %315 = vector.broadcast %314 : vector<1x16xf32> to vector<2x16xf32>
      %316 = arith.addf %313, %315 : vector<2x16xf32>
      %cst_116 = arith.constant 0.000000e+00 : f32
      %317 = vector.broadcast %cst_116 : f32 to vector<2x16xf32>
      %318 = arith.maximumf %316, %317 : vector<2x16xf32>
      %319 = arith.truncf %318 : vector<2x16xf32> to vector<2x16xbf16>
      %c0_117 = arith.constant 0 : index
      %c0_118 = arith.constant 0 : index
      %320 = vector.load %arg21[%c0_117, %c0_118] : memref<16x1xbf16, #tpu.memory_space<vmem>>, vector<16x1xbf16>
      %cst_119 = arith.constant dense<0.000000e+00> : vector<2x1xf32>
      %321 = tpu.matmul %319, %320, %cst_119 {dimension_numbers = #tpu.dot_dimension_numbers<[1], [0], [0], [1], [0, 0, 1, 1], [], []>} : vector<2x16xbf16>, vector<16x1xbf16>, vector<2x1xf32> -> vector<2x1xf32>
      %c0_120 = arith.constant 0 : index
      %c0_121 = arith.constant 0 : index
      %322 = vector.load %arg22[%c0_120, %c0_121] : memref<1x1xf32, #tpu.memory_space<vmem>>, vector<1x1xf32>
      %323 = vector.broadcast %322 : vector<1x1xf32> to vector<2x1xf32>
      %324 = arith.addf %321, %323 : vector<2x1xf32>
      %c0_122 = arith.constant 0 : index
      %c0_123 = arith.constant 0 : index
      %325 = vector.load %arg23[%c0_122, %c0_123] : memref<2x1xf32, #tpu.memory_space<vmem>>, vector<2x1xf32>
      tpu.vector_store %arg23[%c0_122, %c0_123], %324 {strides = array<i32>} : memref<2x1xf32, #tpu.memory_space<vmem>>, vector<2x1xf32>,
    } else {
    }
    return
  }
  func.func @transform_0(%arg0: i32) -> (i32, i32) {
    %c0_i32 = arith.constant 0 : i32
    %c0_i32_0 = arith.constant 0 : i32
    %c0_i32_1 = arith.constant 0 : i32
    return %c0_i32, %c0_i32_0 : i32, i32
  }
  func.func @transform_1(%arg0: i32) -> (i32, i32) {
    %c0_i32 = arith.constant 0 : i32
    %c0_i32_0 = arith.constant 0 : i32
    %c0_i32_1 = arith.constant 0 : i32
    return %c0_i32, %c0_i32_0 : i32, i32
  }
  func.func @transform_2(%arg0: i32) -> (i32, i32) {
    %c0_i32 = arith.constant 0 : i32
    %c0_i32_0 = arith.constant 0 : i32
    %c0_i32_1 = arith.constant 0 : i32
    return %c0_i32, %c0_i32_0 : i32, i32
  }
  func.func @transform_3(%arg0: i32) -> (i32, i32) {
    %c0_i32 = arith.constant 0 : i32
    %c0_i32_0 = arith.constant 0 : i32
    %c0_i32_1 = arith.constant 0 : i32
    return %c0_i32, %c0_i32_0 : i32, i32
  }
  func.func @transform_4(%arg0: i32) -> (i32, i32, i32) {
    %c0_i32 = arith.constant 0 : i32
    %c0_i32_0 = arith.constant 0 : i32
    %c0_i32_1 = arith.constant 0 : i32
    return %arg0, %c0_i32, %c0_i32_0 : i32, i32, i32
  }
  func.func @transform_5(%arg0: i32) -> (i32, i32, i32) {
    %c0_i32 = arith.constant 0 : i32
    %c0_i32_0 = arith.constant 0 : i32
    %c0_i32_1 = arith.constant 0 : i32
    return %arg0, %c0_i32, %c0_i32_0 : i32, i32, i32
  }
  func.func @transform_6(%arg0: i32) -> (i32, i32, i32) {
    %c0_i32 = arith.constant 0 : i32
    %c0_i32_0 = arith.constant 0 : i32
    %c0_i32_1 = arith.constant 0 : i32
    return %arg0, %c0_i32, %c0_i32_0 : i32, i32, i32
  }
  func.func @transform_7(%arg0: i32) -> (i32, i32, i32) {
    %c0_i32 = arith.constant 0 : i32
    %c0_i32_0 = arith.constant 0 : i32
    %c0_i32_1 = arith.constant 0 : i32
    return %arg0, %c0_i32, %c0_i32_0 : i32, i32, i32
  }
  func.func @transform_8(%arg0: i32) -> (i32, i32, i32) {
    %c0_i32 = arith.constant 0 : i32
    %c0_i32_0 = arith.constant 0 : i32
    %c0_i32_1 = arith.constant 0 : i32
    return %arg0, %c0_i32, %c0_i32_0 : i32, i32, i32
  }
  func.func @transform_9(%arg0: i32) -> (i32, i32, i32) {
    %c0_i32 = arith.constant 0 : i32
    %c0_i32_0 = arith.constant 0 : i32
    %c0_i32_1 = arith.constant 0 : i32
    return %arg0, %c0_i32, %c0_i32_0 : i32, i32, i32
  }
  func.func @transform_10(%arg0: i32) -> (i32, i32, i32) {
    %c0_i32 = arith.constant 0 : i32
    %c0_i32_0 = arith.constant 0 : i32
    %c0_i32_1 = arith.constant 0 : i32
    return %arg0, %c0_i32, %c0_i32_0 : i32, i32, i32
  }
  func.func @transform_11(%arg0: i32) -> (i32, i32, i32) {
    %c0_i32 = arith.constant 0 : i32
    %c0_i32_0 = arith.constant 0 : i32
    %c0_i32_1 = arith.constant 0 : i32
    return %arg0, %c0_i32, %c0_i32_0 : i32, i32, i32
  }
  func.func @transform_12(%arg0: i32) -> (i32, i32, i32) {
    %c0_i32 = arith.constant 0 : i32
    %c0_i32_0 = arith.constant 0 : i32
    %c0_i32_1 = arith.constant 0 : i32
    return %arg0, %c0_i32, %c0_i32_0 : i32, i32, i32
  }
  func.func @transform_13(%arg0: i32) -> (i32, i32, i32) {
    %c0_i32 = arith.constant 0 : i32
    %c0_i32_0 = arith.constant 0 : i32
    %c0_i32_1 = arith.constant 0 : i32
    return %arg0, %c0_i32, %c0_i32_0 : i32, i32, i32
  }
  func.func @transform_14(%arg0: i32) -> (i32, i32, i32) {
    %c0_i32 = arith.constant 0 : i32
    %c0_i32_0 = arith.constant 0 : i32
    %c0_i32_1 = arith.constant 0 : i32
    return %arg0, %c0_i32, %c0_i32_0 : i32, i32, i32
  }
  func.func @transform_15(%arg0: i32) -> (i32, i32, i32) {
    %c0_i32 = arith.constant 0 : i32
    %c0_i32_0 = arith.constant 0 : i32
    %c0_i32_1 = arith.constant 0 : i32
    return %arg0, %c0_i32, %c0_i32_0 : i32, i32, i32
  }
  func.func @transform_16(%arg0: i32) -> (i32, i32) {
    %c0_i32 = arith.constant 0 : i32
    %c0_i32_0 = arith.constant 0 : i32
    %c0_i32_1 = arith.constant 0 : i32
    return %c0_i32, %c0_i32_0 : i32, i32
  }
  func.func @transform_17(%arg0: i32) -> (i32, i32) {
    %c0_i32 = arith.constant 0 : i32
    %c0_i32_0 = arith.constant 0 : i32
    %c0_i32_1 = arith.constant 0 : i32
    return %c0_i32, %c0_i32_0 : i32, i32
  }
  func.func @transform_18(%arg0: i32) -> (i32, i32) {
    %c0_i32 = arith.constant 0 : i32
    %c0_i32_0 = arith.constant 0 : i32
    %c0_i32_1 = arith.constant 0 : i32
    return %c0_i32, %c0_i32_0 : i32, i32
  }
  func.func @transform_19(%arg0: i32) -> (i32, i32) {
    %c0_i32 = arith.constant 0 : i32
    %c0_i32_0 = arith.constant 0 : i32
    %c0_i32_1 = arith.constant 0 : i32
    return %c0_i32, %c0_i32_0 : i32, i32
  }
  func.func @transform_20(%arg0: i32) -> (i32, i32) {
    %c0_i32 = arith.constant 0 : i32
    %c0_i32_0 = arith.constant 0 : i32
    %c0_i32_1 = arith.constant 0 : i32
    return %c0_i32, %c0_i32_0 : i32, i32
  }
  func.func @transform_21(%arg0: i32) -> (i32, i32) {
    %c0_i32 = arith.constant 0 : i32
    %c0_i32_0 = arith.constant 0 : i32
    %c0_i32_1 = arith.constant 0 : i32
    return %c0_i32, %c0_i32_0 : i32, i32
  }
  func.func @transform_22(%arg0: i32) -> (i32, i32) {
    %c0_i32 = arith.constant 0 : i32
    %c0_i32_0 = arith.constant 0 : i32
    %c0_i32_1 = arith.constant 0 : i32
    return %c0_i32, %c0_i32_0 : i32, i32
  }
}

</mosaic_0001>

<bundles_post_ra>
// kernel: bert_regression_forward.1
= control target key start
LH: loop header
LB: loop body
LE: loop exit
PB: predicated region body
PF: predicated region fallthrough
CT: control target
= control target key end

     0   :  { %s3103_s29 = smov 0   ;;  %s3508_s0 = inlined_call_operand.vmem [shape: f32[16,32], index: 0, kind: input, shape index: {}]   ;;  %s3509_s1 = inlined_call_operand.vmem [shape: f32[2,8], index: 1, kind: input, shape index: {}]   ;;  %s3510_s2 = inlined_call_operand.vmem [shape: f32[1,32], index: 2, kind: input, shape index: {}]   ;;  %s3511_s3 = inlined_call_operand.vmem [shape: f32[1,32], index: 3, kind: input, shape index: {}]   ;;  %s3512_s4 = inlined_call_operand.vmem [shape: bf16[2,32,96], index: 4, kind: input, shape index: {}]   ;;  %s3513_s5 = inlined_call_operand.vmem [shape: f32[2,1,96], index: 5, kind: input, shape index: {}]   ;;  %s3514_s6 = inlined_call_operand.vmem [shape: bf16[2,32,32], index: 6, kind: input, shape index: {}]   ;;  %s3515_s7 = inlined_call_operand.vmem [shape: f32[2,1,32], index: 7, kind: input, shape index: {}]   ;;  %s3516_s8 = inlined_call_operand.vmem [shape: f32[2,1,32], index: 8, kind: input, shape index: {}]   ;;  %s3517_s9 = inlined_call_operand.vmem [shape: f32[2,1,32], index: 9, kind: input, shape index: {}]   ;;  %s3518_s10 = inlined_call_operand.vmem [shape: bf16[2,32,64], index: 10, kind: input, shape index: {}]   ;;  %s3519_s11 = inlined_call_operand.vmem [shape: f32[2,1,64], index: 11, kind: input, shape index: {}]   ;;  %s3520_s12 = inlined_call_operand.vmem [shape: bf16[2,64,32], index: 12, kind: input, shape index: {}]   ;;  %s3521_s13 = inlined_call_operand.vmem [shape: f32[2,1,32], index: 13, kind: input, shape index: {}]   ;;  %s3522_s14 = inlined_call_operand.vmem [shape: f32[2,1,32], index: 14, kind: input, shape index: {}]   ;;  %s3523_s15 = inlined_call_operand.vmem [shape: f32[2,1,32], index: 15, kind: input, shape index: {}]   ;;  %s3524_s16 = inlined_call_operand.vmem [shape: bf16[32,16], index: 16, kind: input, shape index: {}]   ;;  %s3525_s17 = inlined_call_operand.vmem [shape: f32[1,16], index: 17, kind: input, shape index: {}]   ;;  %s3526_s18 = inlined_call_operand.vmem [shape: bf16[16,16], index: 18, kind: input, shape index: {}]   ;;  %s3527_s19 = inlined_call_operand.vmem [shape: f32[1,16], index: 19, kind: input, shape index: {}]   ;;  %s3528_s20 = inlined_call_operand.vmem [shape: bf16[16,1], index: 20, kind: input, shape index: {}]   ;;  %s3529_s21 = inlined_call_operand.<no memory space> [shape: f32[1,1], index: 21, kind: input, shape index: {}]   ;;  %s3530_s22 = inlined_call_operand.vmem [shape: f32[2,1], index: 22, kind: output, shape index: {}]  }
   0x1   :  { %3534 = sst [smem:[#allocation5_spill]] %s3508_s0  ;;  %v27_v0 = vstv %s3529_s21 }
   0x2   :  { %3535 = sst [smem:[#allocation6_spill]] %s3509_s1  ;;  %28 = vst [vmem:[#allocation3] sm:$0x1] %v27_v0 }
   0x3   :  { %3536 = sst [smem:[#allocation7_spill]] %s3510_s2 }
   0x4   :  { %3537 = sst [smem:[#allocation8_spill]] %s3511_s3 }
   0x5   :  { %3538 = sst [smem:[#allocation9_spill]] %s3512_s4 }
   0x6   :  { %3539 = sst [smem:[#allocation10_spill]] %s3513_s5 }
   0x7   :  { %3540 = sst [smem:[#allocation11_spill]] %s3514_s6 }
   0x8   :  { %3541 = sst [smem:[#allocation12_spill]] %s3525_s17 }
   0x9   :  { %3542 = sst [smem:[#allocation13_spill]] %s3526_s18 }
   0xa   :  { %3543 = sst [smem:[#allocation14_spill]] %s3527_s19 }
   0xb   :  { %3544 = sst [smem:[#allocation15_spill]] %s3528_s20 }
   0xc   :  { %3545 = sst [smem:[#allocation16_spill]] %s3530_s22 }
   0xd LB: > { %3546 = sst [smem:[#allocation4_spill]] %s2965_s29  ;;  %s3109_s30 = sadd.s32 4294967295, %s2965_s29   ;;  %s2965_s29 = sphi %s3103_s29, %s34_s29  }
   0xe   : > { %p2584_p0 = scmp.ge.s32.totalorder %s2965_s29, 1  ;;  %p703_p1 = scmp.lt.s32.totalorder %s2965_s29, 3 }
  0x10   : > { %p704_p2 = pnand %p2584_p0, %p703_p1 }
  0x11   : > { %p799_p3 = scmp.lt.s32.totalorder (!%p704_p2), %s3109_s30, 1  ;;  %s3548_s25 = sld [smem:[#allocation9_spill]] (!%p704_p2) }
  0x12   : > { %707 = sbr.rel (%p704_p2) target bundleno = 3467 (0xd8b), region = 108  ;;  %s3549_s3 = sld [smem:[#allocation11_spill]] (!%p704_p2) }
  0x13   : > { %p2593_p4 = scmp.ne.s32.totalorder (!%p704_p2), %s3109_s30, 0 }
  0x17   : > { %s3115_s21 = scalar_select %p799_p3, %s3109_s30, 1 }
  0x18   : > { %s3550_s22 = sld [smem:[#allocation5_spill]] (!%p2593_p4) }
  0x19   : > { %s2647_s4 = sshll.u32 %s3115_s21, 4  ;;  %s2650_s5 = sshll.u32 %s3115_s21, 5 }
  0x1a   : > { %s3125_s26 = scalar_lea.vmem %s3548_s25, %s2647_s4  ;;  %s3130_s28 = scalar_lea.vmem %s3549_s3, %s2647_s4 }
  0x1b   : > { %s3147_s25 = scalar_lea.vmem %s3518_s10, %s2647_s4  ;;  %s828_s3 = scalar_lea.vmem %s3519_s11, %s3115_s21 }
  0x1c   : > { %s3157_s19 = scalar_lea.vmem %s3520_s12, %s2650_s5  ;;  %s836_s0 = scalar_lea.vmem %s3521_s13, %s3115_s21 }
  0x1d   : > { %s839_s24 = scalar_lea.vmem %s3522_s14, %s3115_s21  ;;  %s842_s18 = scalar_lea.vmem %s3523_s15, %s3115_s21 }
  0x1e   : > { %847 = sbr.rel (%p2593_p4) target bundleno = 349 (0x15d), region = 112  ;;  %s3551_s20 = sld [smem:[#allocation7_spill]] (!%p2593_p4) }
  0x1f   : > { %s3552_s6 = sld [smem:[#allocation8_spill]] (!%p2593_p4) }
  0x23   : > { %v848_v1 = vld [vmem:[%s3550_s22] sm:$0xff]  ;;  %vm852_vm0 = vcmask 261120   ;;  %v849_v2 = vld [vmem:[%s3550_s22 + $0x8] sm:$0xff] }
  0x24   : > { %v853_v3 = vsel %vm852_vm0, %v848_v1, 0.0  ;;  %v856_v4 = vsel %vm852_vm0, %v849_v2, 0.0  ;;  %v2594_v22 = vld [vmem:[%s3551_s20] ss:$0 sm:$0xff] }
  0x25   : > { %854 = vadd.xlane.f32.xlu0 %v853_v3  ;;  %v2595_v24 = vld [vmem:[%s3552_s6] ss:$0 sm:$0xff] }
  0x29   : > { %857 = vadd.xlane.f32.xlu0 %v856_v4 }
  0xae   : > { %v855_v5 = vpop.xlane.xlu0 %854 }
  0xaf   : > { %v860_v6 = vmul.f32 0.03125, %v855_v5 }
  0xb1   : > { %v862_v7 = vsub.f32 %v848_v1, %v860_v6 }
  0xb2   : > { %v858_v8 = vpop.xlane.xlu0 %857 }
  0xb3   : > { %v861_v9 = vmul.f32 0.03125, %v858_v8  ;;  %v864_v10 = vmul.f32 %v862_v7, %v862_v7 }
  0xb5   : > { %v863_v11 = vsub.f32 %v849_v2, %v861_v9  ;;  %v866_v12 = vsel %vm852_vm0, %v864_v10, 0.0 }
  0xb6   : > { %867 = vadd.xlane.f32.xlu1 %v866_v12 }
  0xb7   : > { %v865_v13 = vmul.f32 %v863_v11, %v863_v11 }
  0xb9   : > { %v869_v14 = vsel %vm852_vm0, %v865_v13, 0.0 }
  0xba   : > { %870 = vadd.xlane.f32.xlu1 %v869_v14 }
 0x13f   : > { %v868_v15 = vpop.xlane.xlu1 %867 }
 0x140   : > { %v872_v16 = vmul.f32 0.03125, %v868_v15 }
 0x142   : > { %v874_v17 = vadd.f32 1e-12, %v872_v16 }
 0x143   : > { %v871_v18 = vpop.xlane.xlu1 %870 }
 0x144   : > { %2882 = vrsqrt.f32 %v874_v17  ;;  %v873_v19 = vmul.f32 0.03125, %v871_v18 }
 0x146   : > { %v875_v20 = vadd.f32 1e-12, %v873_v19 }
 0x148   : > { %2884 = vrsqrt.f32 %v875_v20 }
 0x151   : > { %v2883_v21 = vpop.eup %2882 }
 0x152   : > { %v878_v23 = vmul.f32 %v2883_v21, %v862_v7 }
 0x154   : > { %v886_v25 = vmul.f32 %v2594_v22, %v878_v23 }
 0x155   : > { %v2885_v26 = vpop.eup %2884 }
 0x156   : > { %v894_v27 = vadd.f32 %v2595_v24, %v886_v25  ;;  %v879_v28 = vmul.f32 %v2885_v26, %v863_v11 }
 0x158   : > { %896 = vst.msk [vmem:[#allocation2] sm:$0xff] %vm852_vm0, %v894_v27  ;;  %v887_v29 = vmul.f32 %v2594_v22, %v879_v28 }
 0x15a   : > { %v895_v30 = vadd.f32 %v2595_v24, %v887_v29 }
 0x15c   : > { %897 = vst.msk [vmem:[#allocation2 + $0x8] sm:$0xff] %vm852_vm0, %v895_v30 }
 0x15d PF: > { %v2901_v31 = vld [vmem:[%s3125_s26 + $0x8] sm:$0xff]   ;;  %v2967_v32 = vmov 0.0   ;;  %v2902_v33 = vld [vmem:[%s3125_s26] sm:$0xff]   ;;  %vm2968_vm1 = vmmov 0   ;;  %vm924_vm2 = vcmask 261120   ;;  %s3553_s27 = sld [smem:[#allocation10_spill]]  ;;  %v1024_v4 = vlaneseq }
 0x15e   : > { %2704 = vmatprep.subr.bf16.mxu0 %v2967_v32  ;;  %2712 = vmatprep.subr.bf16.mxu1 %v2967_v32  ;;  %s2969_s29 = smov 120   ;;  %s2970_s1 = smov 96   ;;  %vm976_vm3 = vcmask 64512   ;;  %vm1046_vm4 = vcmask 1043456   ;;  %vm1439_vm5 = vcmask 130048   ;;  %vm1441_vm6 = vcmask 195584  }
 0x15f   : > { %2705 = vmatpush3.bf16.msra.mxu0 %v2901_v31  ;;  %2708 = vmatprep.mubr.msk.bf16.mxu0 %vm2968_vm1, %v2967_v32  ;;  %v3196_v34 = vld [vmem:[#allocation2] sm:$0xff]  ;;  %s2971_s17 = smov 80   ;;  %s2972_s20 = smov 88   ;;  %v1025_v7 = vshrl.u32 %v1024_v4, 7  ;;  %vm2154_vm7 = vcmask 523264  }
 0x160   : > { %2706 = vmatprep.subr.bf16.mxu0 %v2967_v32  ;;  %2714 = vmatprep.mubr.msk.bf16.mxu1 %vm2968_vm1, %v2967_v32  ;;  %s2973_s23 = smov 72   ;;  %s2974_s4 = smov 112  }
 0x161   : > { %s2975_s6 = smov 104   ;;  %v1026_v9 = vsub.s32 0, %v1025_v7  ;;  %s2982_s26 = smov 24  }
 0x162   : > { %p2634_p5 = scmp.ne.s32.totalorder %s3109_s30, 1 }
 0x163   : > { %v3198_v35 = vld [vmem:[#allocation2 + $0x8] sm:$0xff]  ;;  %2707 = vmatpush3.bf16.msra.mxu0 %v2902_v33  ;;  %s3554_s5 = scalar_lea.vmem %s3553_s27, %s3115_s21  ;;  %s3555_s27 = sld [smem:[#allocation6_spill]] }
 0x164   : > { %v900_v36 = vpack.c.bf16 %v3198_v35, %v3196_v34  ;;  %2718 = vmatprep.subr.bf16.mxu0 %v2967_v32  ;;  %v2596_v37 = vld [vmem:[%s3554_s5] ss:$0 sm:$0xff]  ;;  %s3556_s5 = scalar_lea.vmem %s3515_s7, %s3115_s21  ;;  %s3563_s2 = sld [smem:[#allocation16_spill]] (!%p2634_p5) }
 0x166   : > { %2709 = vmatmul.mubr.msk.bf16.vlgmr.msra.gmra.mxu0 %vm924_vm2, %v900_v36 }
 0x167   : > { %2720 = vmatprep.mubr.msk.bf16.mxu0 %vm2968_vm1, %v2967_v32 }
 0x169   : > { %v969_v5 = vld [vmem:[%s3555_s27] sm:$0x1]  ;;  %v1443_v30 = vld [vmem:[%s3555_s27 + $0x1] sm:$0x1] }
 0x16a   : > { %v970_v6 = vsub.f32 1.0, %v969_v5  ;;  %v1444_v36 = vsub.f32 1.0, %v1443_v30 }
 0x16c   : > { %v971_v8 = vmul.f32 -10000.0, %v970_v6 }
 0x16e   : > { %v1027_v10 = vrot.slane %v971_v8, %v1026_v9 }
 0x226   : > { %v962_v38 = vpop.f32.mrf.mxu0 }
 0x227   : > { %v963_v39 = vadd.f32 %v2596_v37, %v962_v38 }
 0x228   : > { %v2710_v40 = vpop.f32.mrf.mxu0 }
 0x229   : > { %v3214_v41 = vpack.c.bf16 %v963_v39, %v963_v39 }
 0x22a   : > { %v965_v42 = vpop.f32.mrf.mxu0 }
 0x22b   : > { %1090 = vrot.lane.b32.xlu1 %v3214_v41, %s2969_s29  ;;  %974 = vrot.lane.b32.xlu0 %v3214_v41, %s2970_s1  ;;  %v966_v44 = vadd.f32 %v2596_v37, %v965_v42  ;;  %v1445_v42 = vmul.f32 -10000.0, %v1444_v36 }
 0x22c   : > { %v2711_v43 = vpop.f32.mrf.mxu0 }
 0x22d   : > { %v3222_v45 = vpack.c.bf16 %v966_v44, %v966_v44 }
 0x22f   : > { %1204 = vrot.lane.b32.xlu1 %v3214_v41, %s2971_s17  ;;  %1092 = vrot.lane.b32.xlu0 %v3214_v41, %s2972_s20 }
 0x233   : > { %1316 = vrot.lane.b32.xlu1 %v3214_v41, %s2973_s23  ;;  %1202 = vrot.lane.b32.xlu0 %v3214_v41, %s2974_s4 }
 0x237   : > { %1314 = vrot.lane.b32.xlu0 %v3214_v41, %s2975_s6  ;;  %1448 = vrot.lane.b32.xlu1 %v3222_v45, %s2970_s1  ;;  %s2976_s1 = smov 56  }
 0x23b   : > { %1564 = vrot.lane.b32.xlu0 %v3222_v45, %s2972_s20  ;;  %1562 = vrot.lane.b32.xlu1 %v3222_v45, %s2969_s29  ;;  %s2978_s20 = smov 48  }
 0x23f   : > { %1676 = vrot.lane.b32.xlu0 %v3222_v45, %s2971_s17  ;;  %1674 = vrot.lane.b32.xlu1 %v3222_v45, %s2974_s4  ;;  %s2977_s17 = smov 64   ;;  %s2980_s4 = smov 8  }
 0x243   : > { %1788 = vrot.lane.b32.xlu0 %v3222_v45, %s2973_s23  ;;  %1786 = vrot.lane.b32.xlu1 %v3222_v45, %s2975_s6  ;;  %s2979_s23 = smov 40   ;;  %s2981_s6 = smov 16  }
 0x29d   : > { %v975_v46 = vpop.permute.xlu0 %974  ;;  %v1091_v49 = vpop.permute.xlu1 %1090 }
 0x29e   : > { %v981_v47 = vsel %vm976_vm3, %v975_v46, 0 }
 0x29f   : > { %2713 = vmatpush3.bf16.xpose.msra.mxu1 %v981_v47  ;;  %v1500_v47 = vrot.slane %v1445_v42, %v1026_v9 }
 0x2a0   : > { %2724 = vmatprep.subr.bf16.mxu1 %v2967_v32 }
 0x2a1   : > { %v1093_v48 = vpop.permute.xlu0 %1092  ;;  %v1205_v51 = vpop.permute.xlu1 %1204 }
 0x2a2   : > { %v1098_v50 = vsel %vm976_vm3, %v1093_v48, 0  ;;  %v1210_v52 = vsel %vm976_vm3, %v1205_v51, 0 }
 0x2a5   : > { %v1317_v53 = vpop.permute.xlu1 %1316  ;;  %v1203_v54 = vpop.permute.xlu0 %1202 }
 0x2a6   : > { %2715 = vmatmul.mubr.msk.bf16.vlgmr.msra.gmra.mxu1 %vm976_vm3, %v3214_v41  ;;  %v1322_v55 = vsel %vm976_vm3, %v1317_v53, 0 }
 0x2a7   : > { %2725 = vmatpush3.bf16.xpose.msra.mxu1 %v1098_v50  ;;  %2726 = vmatprep.mubr.msk.bf16.mxu1 %vm2968_vm1, %v2967_v32 }
 0x2a8   : > { %2736 = vmatprep.subr.bf16.mxu1 %v2967_v32 }
 0x2a9   : > { %v1449_v56 = vpop.permute.xlu1 %1448  ;;  %v1315_v57 = vpop.permute.xlu0 %1314 }
 0x2aa   : > { %v1454_v58 = vsel %vm976_vm3, %v1449_v56, 0 }
 0x2ad   : > { %v1565_v59 = vpop.permute.xlu0 %1564  ;;  %v1563_v62 = vpop.permute.xlu1 %1562 }
 0x2ae   : > { %2727 = vmatmul.mubr.msk.bf16.vlgmr.msra.gmra.mxu1 %vm976_vm3, %v1091_v49  ;;  %v1570_v60 = vsel %vm976_vm3, %v1565_v59, 0 }
 0x2af   : > { %2737 = vmatpush3.bf16.xpose.msra.mxu1 %v1210_v52  ;;  %2738 = vmatprep.mubr.msk.bf16.mxu1 %vm2968_vm1, %v2967_v32 }
 0x2b0   : > { %2748 = vmatprep.subr.bf16.mxu1 %v2967_v32 }
 0x2b1   : > { %v1677_v61 = vpop.permute.xlu0 %1676  ;;  %v1675_v1 = vpop.permute.xlu1 %1674 }
 0x2b2   : > { %v1682_v63 = vsel %vm976_vm3, %v1677_v61, 0 }
 0x2b5   : > { %v1789_v0 = vpop.permute.xlu0 %1788  ;;  %v1787_v3 = vpop.permute.xlu1 %1786 }
 0x2b6   : > { %2739 = vmatmul.mubr.msk.bf16.vlgmr.msra.gmra.mxu1 %vm976_vm3, %v1203_v54  ;;  %v1794_v2 = vsel %vm976_vm3, %v1789_v0, 0 }
 0x2b7   : > { %2749 = vmatpush3.bf16.xpose.msra.mxu1 %v1322_v55  ;;  %2750 = vmatprep.mubr.msk.bf16.mxu1 %vm2968_vm1, %v2967_v32 }
 0x2b8   : > { %2760 = vmatprep.subr.bf16.mxu1 %v2967_v32 }
 0x2be   : > { %2751 = vmatmul.mubr.msk.bf16.vlgmr.msra.gmra.mxu1 %vm976_vm3, %v1315_v57 }
 0x2bf   : > { %2761 = vmatpush3.bf16.xpose.msra.mxu1 %v1454_v58  ;;  %2762 = vmatprep.mubr.msk.bf16.mxu1 %vm2968_vm1, %v2967_v32 }
 0x2c0   : > { %2772 = vmatprep.subr.bf16.mxu1 %v2967_v32 }
 0x2c6   : > { %2763 = vmatmul.mubr.msk.bf16.vlgmr.msra.gmra.mxu1 %vm976_vm3, %v3222_v45 }
 0x2c7   : > { %2773 = vmatpush3.bf16.xpose.msra.mxu1 %v1570_v60  ;;  %2774 = vmatprep.mubr.msk.bf16.mxu1 %vm2968_vm1, %v2967_v32 }
 0x2c8   : > { %2784 = vmatprep.subr.bf16.mxu1 %v2967_v32 }
 0x2ce   : > { %2775 = vmatmul.mubr.msk.bf16.vlgmr.msra.gmra.mxu1 %vm976_vm3, %v1563_v62 }
 0x2cf   : > { %2785 = vmatpush3.bf16.xpose.msra.mxu1 %v1682_v63  ;;  %2786 = vmatprep.mubr.msk.bf16.mxu1 %vm2968_vm1, %v2967_v32 }
 0x2d0   : > { %2796 = vmatprep.subr.bf16.mxu1 %v2967_v32 }
 0x2d6   : > { %2787 = vmatmul.mubr.msk.bf16.vlgmr.msra.gmra.mxu1 %vm976_vm3, %v1675_v1 }
 0x2d7   : > { %2797 = vmatpush3.bf16.xpose.msra.mxu1 %v1794_v2  ;;  %2798 = vmatprep.mubr.msk.bf16.mxu1 %vm2968_vm1, %v2967_v32 }
 0x2d8   : > { %2808 = vmatprep.subr.bf16.mxu1 %v2967_v32 }
 0x2de   : > { %2799 = vmatmul.mubr.msk.bf16.vlgmr.msra.gmra.mxu1 %vm976_vm3, %v1787_v3 }
 0x2df   : > { %2812 = vmatprep.mubr.msk.bf16.mxu1 %vm2968_vm1, %v2967_v32 }
 0x366   : > { %v1017_v11 = vpop.f32.mrf.mxu1 }
 0x367   : > { %v1023_v12 = vmul.f32 0.35355338, %v1017_v11 }
 0x368   : > { %v2716_v13 = vpop.f32.mrf.mxu1 }
 0x369   : > { %v3277_v14 = vadd.f32 %v1027_v10, %v1023_v12 }
 0x36a   : > { %v1020_v15 = vpop.f32.mrf.mxu1 }
 0x36b   : > { %v1029_v16 = vsel %vm976_vm3, %v3277_v14, -inf }
 0x36c   : > { %v2717_v17 = vpop.f32.mrf.mxu1  ;;  %1030 = vmax.xlane.f32.xlu0 %v1029_v16 }
 0x36e   : > { %v1134_v18 = vpop.f32.mrf.mxu1 }
 0x36f   : > { %v1140_v19 = vmul.f32 0.35355338, %v1134_v18 }
 0x370   : > { %v2728_v20 = vpop.f32.mrf.mxu1 }
 0x371   : > { %v3281_v21 = vadd.f32 %v1140_v19, %v1027_v10 }
 0x372   : > { %v1137_v22 = vpop.f32.mrf.mxu1 }
 0x373   : > { %v1142_v23 = vsel %vm976_vm3, %v3281_v21, -inf }
 0x374   : > { %v2729_v24 = vpop.f32.mrf.mxu1  ;;  %1143 = vmax.xlane.f32.xlu1 %v1142_v23 }
 0x376   : > { %v1246_v25 = vpop.f32.mrf.mxu1 }
 0x377   : > { %v1252_v26 = vmul.f32 0.35355338, %v1246_v25 }
 0x378   : > { %v2740_v27 = vpop.f32.mrf.mxu1 }
 0x379   : > { %v3285_v28 = vadd.f32 %v1252_v26, %v1027_v10 }
 0x37a   : > { %v1249_v29 = vpop.f32.mrf.mxu1 }
 0x37b   : > { %v1254_v31 = vsel %vm976_vm3, %v3285_v28, -inf }
 0x37c   : > { %v2741_v33 = vpop.f32.mrf.mxu1  ;;  %1255 = vmax.xlane.f32.xlu0 %v1254_v31 }
 0x37e   : > { %v1358_v37 = vpop.f32.mrf.mxu1 }
 0x37f   : > { %v1364_v38 = vmul.f32 0.35355338, %v1358_v37 }
 0x380   : > { %v2752_v39 = vpop.f32.mrf.mxu1 }
 0x381   : > { %v3292_v40 = vadd.f32 %v1364_v38, %v1027_v10 }
 0x382   : > { %v1361_v43 = vpop.f32.mrf.mxu1 }
 0x383   : > { %v1366_v44 = vsel %vm976_vm3, %v3292_v40, -inf }
 0x384   : > { %v2753_v46 = vpop.f32.mrf.mxu1  ;;  %1367 = vmax.xlane.f32.xlu0 %v1366_v44 }
 0x386   : > { %v1490_v48 = vpop.f32.mrf.mxu1 }
 0x387   : > { %v1496_v49 = vmul.f32 0.35355338, %v1490_v48 }
 0x388   : > { %v2764_v50 = vpop.f32.mrf.mxu1 }
 0x389   : > { %v3296_v51 = vadd.f32 %v1500_v47, %v1496_v49 }
 0x38a   : > { %v1493_v52 = vpop.f32.mrf.mxu1 }
 0x38b   : > { %v1502_v53 = vsel %vm976_vm3, %v3296_v51, -inf }
 0x38c   : > { %1503 = vmax.xlane.f32.xlu1 %v1502_v53  ;;  %v2765_v54 = vpop.f32.mrf.mxu1 }
 0x38e   : > { %v1606_v55 = vpop.f32.mrf.mxu1 }
 0x38f   : > { %v1612_v56 = vmul.f32 0.35355338, %v1606_v55 }
 0x390   : > { %v2776_v57 = vpop.f32.mrf.mxu1 }
 0x391   : > { %v3300_v58 = vadd.f32 %v1612_v56, %v1500_v47 }
 0x392   : > { %v1609_v59 = vpop.f32.mrf.mxu1 }
 0x393   : > { %v1614_v60 = vsel %vm976_vm3, %v3300_v58, -inf }
 0x394   : > { %1615 = vmax.xlane.f32.xlu0 %v1614_v60  ;;  %v2777_v61 = vpop.f32.mrf.mxu1 }
 0x396   : > { %v1718_v62 = vpop.f32.mrf.mxu1 }
 0x397   : > { %v1724_v63 = vmul.f32 0.35355338, %v1718_v62 }
 0x398   : > { %v2788_v0 = vpop.f32.mrf.mxu1 }
 0x399   : > { %v1725_v1 = vadd.f32 %v1724_v63, %v1500_v47 }
 0x39a   : > { %v1721_v2 = vpop.f32.mrf.mxu1 }
 0x39b   : > { %v1726_v3 = vsel %vm976_vm3, %v1725_v1, -inf }
 0x39c   : > { %1727 = vmax.xlane.f32.xlu1 %v1726_v3  ;;  %v2789_v4 = vpop.f32.mrf.mxu1 }
 0x39e   : > { %v1830_v5 = vpop.f32.mrf.mxu1 }
 0x39f   : > { %v1836_v9 = vmul.f32 0.35355338, %v1830_v5 }
 0x3a0   : > { %v2800_v6 = vpop.f32.mrf.mxu1 }
 0x3a1   : > { %v3309_v10 = vadd.f32 %v1836_v9, %v1500_v47 }
 0x3a2   : > { %v1833_v7 = vpop.f32.mrf.mxu1 }
 0x3a3   : > { %v1838_v11 = vsel %vm976_vm3, %v3309_v10, -inf }
 0x3a4   : > { %v2801_v8 = vpop.f32.mrf.mxu1 }
 0x3aa   : > { %1154 = vrot.lane.b32.xlu0 %v3214_v41, %s2976_s1 }
 0x3ad   : > { %1041 = vrot.lane.b32.xlu1 %v3214_v41, %s2977_s17 }
 0x3c9   : > { %1839 = vmax.xlane.f32.xlu0 %v1838_v11 }
 0x3f5   : > { %v1031_v12 = vpop.xlane.xlu0 %1030 }
 0x3f6   : > { %v1032_v13 = vsub.f32 %v3277_v14, %v1031_v12 }
 0x3f8   : > { %v1033_v15 = vmul.f32 1.442695, %v1032_v13 }
 0x3fa   : > { %2911 = vpow2.f32 %v1033_v15 }
 0x3fd   : > { %v1144_v16 = vpop.xlane.xlu1 %1143 }
 0x3fe   : > { %v1145_v17 = vsub.f32 %v3281_v21, %v1144_v16 }
 0x400   : > { %v1146_v18 = vmul.f32 1.442695, %v1145_v17 }
 0x402   : > { %2913 = vpow2.f32 %v1146_v18 }
 0x405   : > { %v1256_v19 = vpop.xlane.xlu0 %1255 }
 0x406   : > { %v1257_v20 = vsub.f32 %v3285_v28, %v1256_v19 }
 0x407   : > { %v3316_v22 = vpop.eup %2911 }
 0x408   : > { %v1258_v23 = vmul.f32 1.442695, %v1257_v20  ;;  %v1035_v24 = vsel %vm976_vm3, %v3316_v22, 0.0 }
 0x409   : > { %1036 = vadd.xlane.f32.xlu1 %v1035_v24 }
 0x40a   : > { %2915 = vpow2.f32 %v1258_v23 }
 0x40d   : > { %v1368_v30 = vpop.xlane.xlu0 %1367 }
 0x40e   : > { %v1369_v33 = vsub.f32 %v3292_v40, %v1368_v30 }
 0x40f   : > { %v3320_v25 = vpop.eup %2913 }
 0x410   : > { %v1148_v14 = vsel %vm976_vm3, %v3320_v25, 0.0  ;;  %v1370_v36 = vmul.f32 1.442695, %v1369_v33 }
 0x411   : > { %1149 = vadd.xlane.f32.xlu0 %v1148_v14 }
 0x412   : > { %2917 = vpow2.f32 %v1370_v36 }
 0x415   : > { %v1504_v27 = vpop.xlane.xlu1 %1503 }
 0x416   : > { %v1505_v37 = vsub.f32 %v3296_v51, %v1504_v27 }
 0x417   : > { %v3324_v21 = vpop.eup %2915 }
 0x418   : > { %v1260_v26 = vsel %vm976_vm3, %v3324_v21, 0.0  ;;  %v1506_v42 = vmul.f32 1.442695, %v1505_v37 }
 0x419   : > { %1261 = vadd.xlane.f32.xlu1 %v1260_v26 }
 0x41a   : > { %2919 = vpow2.f32 %v1506_v42 }
 0x41d   : > { %v1616_v38 = vpop.xlane.xlu0 %1615 }
 0x41e   : > { %v1617_v39 = vsub.f32 %v3300_v58, %v1616_v38 }
 0x420   : > { %v1618_v44 = vmul.f32 1.442695, %v1617_v39 }
 0x421   : > { %v1155_v53 = vpop.permute.xlu0 %1154 }
 0x422   : > { %2921 = vpow2.f32 %v1618_v44 }
 0x425   : > { %v1728_v28 = vpop.xlane.xlu1 %1727 }
 0x426   : > { %v1729_v43 = vsub.f32 %v1725_v1, %v1728_v28  ;;  %v1160_v1 = vsel %vm1046_vm4, %v1155_v53, 0 }
 0x427   : > { %1266 = vrot.lane.b32.xlu0 %v3214_v41, %s2978_s20 }
 0x428   : > { %v1730_v46 = vmul.f32 1.442695, %v1729_v43 }
 0x429   : > { %v1042_v29 = vpop.permute.xlu1 %1041 }
 0x42a   : > { %v1048_v31 = vsel %vm1046_vm4, %v1042_v29, 0  ;;  %1378 = vrot.lane.b32.xlu1 %v3214_v41, %s2979_s23  ;;  %2923 = vpow2.f32 %v1730_v46  ;;  %v2918_v41 = vpop.eup %2917 }
 0x42b   : > { %2719 = vmatpush3.bf16.msra.mxu0 %v1048_v31  ;;  %v1372_v47 = vsel %vm976_vm3, %v2918_v41, 0.0  ;;  %v3338_v48 = vpop.eup %2919 }
 0x42c   : > { %2730 = vmatprep.subr.bf16.mxu0 %v2967_v32  ;;  %v1508_v49 = vsel %vm976_vm3, %v3338_v48, 0.0 }
 0x42f   : > { %v3340_v40 = vpop.eup %2921 }
 0x430   : > { %v1620_v51 = vsel %vm976_vm3, %v3340_v40, 0.0 }
 0x437   : > { %v3344_v50 = vpop.eup %2923 }
 0x438   : > { %v1732_v52 = vsel %vm976_vm3, %v3344_v50, 0.0 }
 0x446   : > { %1373 = vadd.xlane.f32.xlu0 %v1372_v47 }
 0x44a   : > { %1509 = vadd.xlane.f32.xlu0 %v1508_v49 }
 0x44e   : > { %1621 = vadd.xlane.f32.xlu1 %v1620_v51  ;;  %1733 = vadd.xlane.f32.xlu0 %v1732_v52 }
 0x452   : > { %v1840_v54 = vpop.xlane.xlu0 %1839 }
 0x453   : > { %v1841_v55 = vsub.f32 %v3309_v10, %v1840_v54 }
 0x455   : > { %v1842_v56 = vmul.f32 1.442695, %v1841_v55 }
 0x457   : > { %2925 = vpow2.f32 %v1842_v56 }
 0x45f   : > { %1626 = vrot.lane.b32.xlu1 %v3222_v45, %s2976_s1  ;;  %s3559_s1 = sld [smem:[#allocation13_spill]] (!%p2634_p5) }
 0x463   : > { %1738 = vrot.lane.b32.xlu1 %v3222_v45, %s2978_s20  ;;  %s3560_s20 = sld [smem:[#allocation12_spill]] (!%p2634_p5) }
 0x464   : > { %v3355_v57 = vpop.eup %2925 }
 0x465   : > { %v1844_v58 = vsel %vm976_vm3, %v3355_v57, 0.0 }
 0x466   : > { %1845 = vadd.xlane.f32.xlu0 %v1844_v58 }
 0x467   : > { %1850 = vrot.lane.b32.xlu1 %v3222_v45, %s2979_s23  ;;  %s3558_s23 = scalar_lea.vmem %s3517_s9, %s3115_s21 }
 0x47c   : > { %1514 = vrot.lane.b32.xlu0 %v3222_v45, %s2977_s17 }
 0x492   : > { %v1037_v59 = vpop.xlane.xlu1 %1036 }
 0x493   : > { %2927 = vrcp.f32 %v1037_v59 }
 0x49a   : > { %v1150_v60 = vpop.xlane.xlu0 %1149 }
 0x49b   : > { %2929 = vrcp.f32 %v1150_v60 }
 0x49e   : > { %v1267_v3 = vpop.permute.xlu0 %1266 }
 0x49f   : > { %v1272_v5 = vsel %vm1046_vm4, %v1267_v3, 0 }
 0x4a0   : > { %v2928_v61 = vpop.eup %2927 }
 0x4a1   : > { %v1039_v62 = vmul.f32 %v2928_v61, %v3316_v22 }
 0x4a2   : > { %v1262_v63 = vpop.xlane.xlu1 %1261 }
 0x4a3   : > { %2931 = vrcp.f32 %v1262_v63  ;;  %v1040_v0 = vpack.c.bf16 %v1039_v62, %v1039_v62 }
 0x4a5   : > { %2721 = vmatmul.mubr.msk.bf16.vlgmr.msra.gmra.mxu0 %vm976_vm3, %v1040_v0  ;;  %v2903_v0 = vld [vmem:[%s3130_s28 + $0x8] sm:$0xff]  }
 0x4a6   : > { %2731 = vmatpush3.bf16.msra.mxu0 %v1160_v1  ;;  %2732 = vmatprep.mubr.msk.bf16.mxu0 %vm2968_vm1, %v2967_v32  ;;  %v1379_v8 = vpop.permute.xlu1 %1378 }
 0x4a7   : > { %2742 = vmatprep.subr.bf16.mxu0 %v2967_v32  ;;  %v1384_v10 = vsel %vm1046_vm4, %v1379_v8, 0  ;;  %2809 = vmatpush3.bf16.msra.mxu1 %v2903_v0 }
 0x4a8   : > { %v2930_v45 = vpop.eup %2929  ;;  %2810 = vmatprep.subr.bf16.mxu1 %v2967_v32 }
 0x4a9   : > { %v1152_v2 = vmul.f32 %v2930_v45, %v3320_v25 }
 0x4ab   : > { %v1153_v4 = vpack.c.bf16 %v1152_v2, %v1152_v2 }
 0x4ad   : > { %2733 = vmatmul.mubr.msk.bf16.vlgmr.msra.gmra.mxu0 %vm976_vm3, %v1153_v4  ;;  %v2904_v4 = vld [vmem:[%s3130_s28] sm:$0xff]  }
 0x4ae   : > { %2743 = vmatpush3.bf16.msra.mxu0 %v1272_v5  ;;  %2744 = vmatprep.mubr.msk.bf16.mxu0 %vm2968_vm1, %v2967_v32 }
 0x4af   : > { %2754 = vmatprep.subr.bf16.mxu0 %v2967_v32  ;;  %2811 = vmatpush3.bf16.msra.mxu1 %v2904_v4 }
 0x4b0   : > { %v2932_v6 = vpop.eup %2931  ;;  %2824 = vmatprep.subr.bf16.mxu1 %v2967_v32 }
 0x4b1   : > { %v1264_v7 = vmul.f32 %v2932_v6, %v3324_v21 }
 0x4b3   : > { %v1265_v9 = vpack.c.bf16 %v1264_v7, %v1264_v7 }
 0x4b5   : > { %2745 = vmatmul.mubr.msk.bf16.vlgmr.msra.gmra.mxu0 %vm976_vm3, %v1265_v9 }
 0x4b6   : > { %2755 = vmatpush3.bf16.msra.mxu0 %v1384_v10  ;;  %2756 = vmatprep.mubr.msk.bf16.mxu0 %vm2968_vm1, %v2967_v32 }
 0x4b7   : > { %2766 = vmatprep.subr.bf16.mxu0 %v2967_v32 }
 0x4cf   : > { %v1374_v11 = vpop.xlane.xlu0 %1373 }
 0x4d0   : > { %2933 = vrcp.f32 %v1374_v11 }
 0x4d3   : > { %v1510_v15 = vpop.xlane.xlu0 %1509 }
 0x4d4   : > { %2935 = vrcp.f32 %v1510_v15 }
 0x4d7   : > { %v1622_v17 = vpop.xlane.xlu1 %1621  ;;  %v1734_v18 = vpop.xlane.xlu0 %1733 }
 0x4d8   : > { %2937 = vrcp.f32 %v1622_v17 }
 0x4d9   : > { %2939 = vrcp.f32 %v1734_v18 }
 0x4db   : > { %v1627_v25 = vpop.permute.xlu1 %1626 }
 0x4dc   : > { %v1632_v26 = vsel %vm1046_vm4, %v1627_v25, 0 }
 0x4dd   : > { %v2934_v12 = vpop.eup %2933 }
 0x4de   : > { %v1376_v13 = vmul.f32 %v2934_v12, %v2918_v41 }
 0x4df   : > { %v1739_v28 = vpop.permute.xlu1 %1738 }
 0x4e0   : > { %v1377_v16 = vpack.c.bf16 %v1376_v13, %v1376_v13  ;;  %v1744_v31 = vsel %vm1046_vm4, %v1739_v28, 0 }
 0x4e1   : > { %v2936_v19 = vpop.eup %2935 }
 0x4e2   : > { %2757 = vmatmul.mubr.msk.bf16.vlgmr.msra.gmra.mxu0 %vm976_vm3, %v1377_v16  ;;  %v1512_v22 = vmul.f32 %v2936_v19, %v3338_v48 }
 0x4e3   : > { %2768 = vmatprep.mubr.msk.bf16.mxu0 %vm2968_vm1, %v2967_v32  ;;  %v1851_v36 = vpop.permute.xlu1 %1850 }
 0x4e4   : > { %v1513_v14 = vpack.c.bf16 %v1512_v22, %v1512_v22  ;;  %v1856_v39 = vsel %vm1046_vm4, %v1851_v36, 0 }
 0x4e5   : > { %v2938_v21 = vpop.eup %2937 }
 0x4e6   : > { %v1624_v27 = vmul.f32 %v2938_v21, %v3340_v40  ;;  %v2940_v30 = vpop.eup %2939 }
 0x4e7   : > { %v1736_v33 = vmul.f32 %v2940_v30, %v3344_v50 }
 0x4e8   : > { %v1625_v29 = vpack.c.bf16 %v1624_v27, %v1624_v27 }
 0x4e9   : > { %v1737_v37 = vpack.c.bf16 %v1736_v33, %v1736_v33 }
 0x4ef   : > { %v1846_v20 = vpop.xlane.xlu0 %1845 }
 0x4f0   : > { %2941 = vrcp.f32 %v1846_v20 }
 0x4f3   : > { %v1515_v23 = vpop.permute.xlu0 %1514 }
 0x4f4   : > { %v1520_v24 = vsel %vm1046_vm4, %v1515_v23, 0 }
 0x4f5   : > { %2767 = vmatpush3.bf16.msra.mxu0 %v1520_v24 }
 0x4f6   : > { %2778 = vmatprep.subr.bf16.mxu0 %v2967_v32 }
 0x4f8   : > { %2769 = vmatmul.mubr.msk.bf16.vlgmr.msra.gmra.mxu0 %vm976_vm3, %v1513_v14 }
 0x4f9   : > { %2779 = vmatpush3.bf16.msra.mxu0 %v1632_v26  ;;  %2780 = vmatprep.mubr.msk.bf16.mxu0 %vm2968_vm1, %v2967_v32 }
 0x4fa   : > { %2790 = vmatprep.subr.bf16.mxu0 %v2967_v32 }
 0x4fd   : > { %v2942_v38 = vpop.eup %2941 }
 0x4fe   : > { %v1848_v42 = vmul.f32 %v2942_v38, %v3355_v57 }
 0x500   : > { %2781 = vmatmul.mubr.msk.bf16.vlgmr.msra.gmra.mxu0 %vm976_vm3, %v1625_v29  ;;  %v1849_v43 = vpack.c.bf16 %v1848_v42, %v1848_v42 }
 0x501   : > { %2791 = vmatpush3.bf16.msra.mxu0 %v1744_v31  ;;  %2792 = vmatprep.mubr.msk.bf16.mxu0 %vm2968_vm1, %v2967_v32  ;;  %v2616_v31 = vld [vmem:[%s3556_s5] ss:$0 sm:$0xff] }
 0x502   : > { %2802 = vmatprep.subr.bf16.mxu0 %v2967_v32 }
 0x508   : > { %2793 = vmatmul.mubr.msk.bf16.vlgmr.msra.gmra.mxu0 %vm976_vm3, %v1737_v37 }
 0x509   : > { %2803 = vmatpush3.bf16.msra.mxu0 %v1856_v39  ;;  %2804 = vmatprep.mubr.msk.bf16.mxu0 %vm2968_vm1, %v2967_v32 }
 0x50a   : > { %2816 = vmatprep.subr.bf16.mxu0 %v2967_v32 }
 0x510   : > { %2805 = vmatmul.mubr.msk.bf16.vlgmr.msra.gmra.mxu0 %vm976_vm3, %v1849_v43 }
 0x511   : > { %2820 = vmatprep.mubr.msk.bf16.mxu0 %vm2968_vm1, %v2967_v32 }
 0x565   : > { %v1084_v44 = vpop.f32.mrf.mxu0 }
 0x567   : > { %v2722_v46 = vpop.f32.mrf.mxu0 }
 0x569   : > { %v1087_v41 = vpop.f32.mrf.mxu0 }
 0x56b   : > { %v2723_v47 = vpop.f32.mrf.mxu0 }
 0x56d   : > { %v1196_v48 = vpop.f32.mrf.mxu0 }
 0x56f   : > { %v2734_v40 = vpop.f32.mrf.mxu0 }
 0x571   : > { %v1199_v49 = vpop.f32.mrf.mxu0 }
 0x573   : > { %v2735_v50 = vpop.f32.mrf.mxu0 }
 0x575   : > { %v1308_v51 = vpop.f32.mrf.mxu0 }
 0x577   : > { %v2746_v52 = vpop.f32.mrf.mxu0 }
 0x579   : > { %v1311_v53 = vpop.f32.mrf.mxu0 }
 0x57b   : > { %v2747_v54 = vpop.f32.mrf.mxu0 }
 0x5a2   : > { %v1420_v55 = vpop.f32.mrf.mxu0 }
 0x5a4   : > { %v2758_v56 = vpop.f32.mrf.mxu0 }
 0x5a6   : > { %v1423_v57 = vpop.f32.mrf.mxu0 }
 0x5a8   : > { %v2759_v58 = vpop.f32.mrf.mxu0 }
 0x5b8   : > { %v1556_v59 = vpop.f32.mrf.mxu0 }
 0x5ba   : > { %v2770_v60 = vpop.f32.mrf.mxu0 }
 0x5bc   : > { %v1559_v61 = vpop.f32.mrf.mxu0 }
 0x5be   : > { %v2771_v62 = vpop.f32.mrf.mxu0 }
 0x5c0   : > { %v1668_v63 = vpop.f32.mrf.mxu0 }
 0x5c1   : > { %v2886_v1 = vpack.i.bf16 %v1668_v63, %v1196_v48 }
 0x5c2   : > { %v2782_v45 = vpop.f32.mrf.mxu0 }
 0x5c3   : > { %2887 = vrot.lane.b32.xlu1 %v2886_v1, %s2980_s4 }
 0x5c4   : > { %v1671_v2 = vpop.f32.mrf.mxu0 }
 0x5c6   : > { %v2783_v3 = vpop.f32.mrf.mxu0 }
 0x5c7   : > { %v2621_v3 = vld [vmem:[%s3558_s23] ss:$0 sm:$0xff] }
 0x5c8   : > { %v1780_v5 = vpop.f32.mrf.mxu0 }
 0x5c9   : > { %v2891_v6 = vpack.i.bf16 %v1780_v5, %v1308_v51 }
 0x5ca   : > { %v2794_v7 = vpop.f32.mrf.mxu0 }
 0x5cb   : > { %2892 = vrot.lane.b32.xlu1 %v2891_v6, %s2981_s6  ;;  %s3561_s6 = sld [smem:[#allocation15_spill]] (!%p2634_p5) }
 0x5cc   : > { %v1783_v8 = vpop.f32.mrf.mxu0 }
 0x5cd   : > { %v2907_v8 = vld [vmem:[%s3157_s19 + $0x18] sm:$0xff]  }
 0x5ce   : > { %v2795_v9 = vpop.f32.mrf.mxu0 }
 0x5cf   : > { %v2908_v9 = vld [vmem:[%s3157_s19 + $0x10] sm:$0xff]  }
 0x5d0   : > { %v1892_v10 = vpop.f32.mrf.mxu0 }
 0x5d1   : > { %v2896_v11 = vpack.i.bf16 %v1892_v10, %v1420_v55  ;;  %v2906_v55 = vld [vmem:[%s3147_s25] sm:$0xff]   ;;  %v2909_v10 = vld [vmem:[%s3157_s19 + $0x8] sm:$0xff]  }
 0x5d2   : > { %v2806_v12 = vpop.f32.mrf.mxu0 }
 0x5d3   : > { %2897 = vrot.lane.b32.xlu0 %v2896_v11, %s2982_s26  ;;  %v2910_v11 = vld [vmem:[%s3157_s19] sm:$0xff]  }
 0x5d4   : > { %v1895_v13 = vpop.f32.mrf.mxu0  ;;  %v2622_v12 = vld [vmem:[%s828_s3] ss:$0 sm:$0xff] }
 0x5d6   : > { %v2807_v15 = vpop.f32.mrf.mxu0 }
 0x635   : > { %v2888_v16 = vpop.permute.xlu1 %2887 }
 0x636   : > { %v2890_v18 = vunpack.i.h.bf16 %v2888_v16  ;;  %v2889_v19 = vunpack.i.l.bf16 %v2888_v16 }
 0x638   : > { %v1910_v24 = vsel %vm976_vm3, %v1556_v59, %v2890_v18  ;;  %v1438_v25 = vsel %vm976_vm3, %v1084_v44, %v2889_v19 }
 0x63d   : > { %v2893_v17 = vpop.permute.xlu1 %2892 }
 0x63e   : > { %v2895_v20 = vunpack.i.h.bf16 %v2893_v17  ;;  %v2894_v22 = vunpack.i.l.bf16 %v2893_v17 }
 0x640   : > { %v1911_v26 = vsel %vm1439_vm5, %v1910_v24, %v2895_v20  ;;  %v1440_v27 = vsel %vm1439_vm5, %v1438_v25, %v2894_v22 }
 0x645   : > { %v2898_v23 = vpop.permute.xlu0 %2897 }
 0x646   : > { %v2900_v14 = vunpack.i.h.bf16 %v2898_v23  ;;  %v2899_v21 = vunpack.i.l.bf16 %v2898_v23 }
 0x648   : > { %v1912_v28 = vsel %vm1441_vm6, %v1911_v26, %v2900_v14  ;;  %v1442_v29 = vsel %vm1441_vm6, %v1440_v27, %v2899_v21 }
 0x649   : > { %v1913_v30 = vpack.c.bf16 %v1912_v28, %v1442_v29 }
 0x64b   : > { %2813 = vmatmul.mubr.msk.bf16.vlgmr.msra.gmra.mxu1 %vm924_vm2, %v1913_v30 }
 0x64c   : > { %2832 = vmatprep.mubr.msk.bf16.mxu1 %vm2968_vm1, %v2967_v32  ;;  %2825 = vmatpush3.bf16.msra.mxu1 %v2907_v8 }
 0x64d   : > { %2826 = vmatprep.subr.bf16.mxu1 %v2967_v32 }
 0x650   : > { %2827 = vmatpush3.bf16.msra.mxu1 %v2908_v9 }
 0x651   : > { %2828 = vmatprep.subr.bf16.mxu1 %v2967_v32 }
 0x654   : > { %2829 = vmatpush3.bf16.msra.mxu1 %v2909_v10 }
 0x655   : > { %2830 = vmatprep.subr.bf16.mxu1 %v2967_v32 }
 0x658   : > { %2831 = vmatpush3.bf16.msra.mxu1 %v2910_v11 }
 0x70b   : > { %v1974_v33 = vpop.f32.mrf.mxu1 }
 0x70c   : > { %v1975_v36 = vadd.f32 %v2616_v31, %v1974_v33 }
 0x70d   : > { %v2814_v37 = vpop.f32.mrf.mxu1 }
 0x70e   : > { %v1981_v38 = vadd.f32 %v1975_v36, %v3196_v34 }
 0x70f   : > { %v1977_v39 = vpop.f32.mrf.mxu1 }
 0x710   : > { %v1978_v42 = vadd.f32 %v2616_v31, %v1977_v39  ;;  %v1985_v43 = vsel %vm924_vm2, %v1981_v38, 0.0 }
 0x711   : > { %1986 = vadd.xlane.f32.xlu1 %v1985_v43  ;;  %v2815_v44 = vpop.f32.mrf.mxu1 }
 0x712   : > { %v1982_v46 = vadd.f32 %v1978_v42, %v3198_v35  ;;  %v2905_v35 = vld [vmem:[%s3147_s25 + $0x8] sm:$0xff]   ;;  %s3557_s25 = scalar_lea.vmem %s3516_s8, %s3115_s21  ;;  %v2626_v42 = vld [vmem:[%s836_s0] ss:$0 sm:$0xff]  ;;  %s3562_s0 = sld [smem:[#allocation14_spill]] (!%p2634_p5) }
 0x713   : > { %2817 = vmatpush3.bf16.msra.mxu0 %v2905_v35  ;;  %v2620_v0 = vld [vmem:[%s3557_s25] ss:$0 sm:$0xff] }
 0x714   : > { %v1988_v41 = vsel %vm924_vm2, %v1982_v46, 0.0  ;;  %2818 = vmatprep.subr.bf16.mxu0 %v2967_v32 }
 0x715   : > { %1989 = vadd.xlane.f32.xlu0 %v1988_v41 }
 0x717   : > { %2819 = vmatpush3.bf16.msra.mxu0 %v2906_v55 }
 0x79a   : > { %v1987_v47 = vpop.xlane.xlu1 %1986 }
 0x79b   : > { %v1992_v48 = vmul.f32 0.03125, %v1987_v47 }
 0x79d   : > { %v1994_v40 = vsub.f32 %v1981_v38, %v1992_v48 }
 0x79e   : > { %v1990_v49 = vpop.xlane.xlu0 %1989 }
 0x79f   : > { %v1993_v50 = vmul.f32 0.03125, %v1990_v49  ;;  %v1996_v51 = vmul.f32 %v1994_v40, %v1994_v40 }
 0x7a1   : > { %v1995_v34 = vsub.f32 %v1982_v46, %v1993_v50  ;;  %v1998_v52 = vsel %vm924_vm2, %v1996_v51, 0.0 }
 0x7a2   : > { %1999 = vadd.xlane.f32.xlu0 %v1998_v52 }
 0x7a3   : > { %v1997_v53 = vmul.f32 %v1995_v34, %v1995_v34 }
 0x7a5   : > { %v2001_v54 = vsel %vm924_vm2, %v1997_v53, 0.0 }
 0x7a6   : > { %2002 = vadd.xlane.f32.xlu1 %v2001_v54 }
 0x82b   : > { %v2000_v56 = vpop.xlane.xlu0 %1999 }
 0x82c   : > { %v2004_v57 = vmul.f32 0.03125, %v2000_v56 }
 0x82e   : > { %v2006_v58 = vadd.f32 1e-12, %v2004_v57 }
 0x82f   : > { %v2003_v59 = vpop.xlane.xlu1 %2002 }
 0x830   : > { %2943 = vrsqrt.f32 %v2006_v58  ;;  %v2005_v60 = vmul.f32 0.03125, %v2003_v59 }
 0x832   : > { %v2007_v61 = vadd.f32 1e-12, %v2005_v60 }
 0x834   : > { %2945 = vrsqrt.f32 %v2007_v61 }
 0x83d   : > { %v2944_v62 = vpop.eup %2943 }
 0x83e   : > { %v2010_v63 = vmul.f32 %v2944_v62, %v1994_v40 }
 0x840   : > { %v2018_v2 = vmul.f32 %v2620_v0, %v2010_v63 }
 0x841   : > { %v2946_v1 = vpop.eup %2945 }
 0x842   : > { %v2011_v45 = vmul.f32 %v2946_v1, %v1995_v34  ;;  %v2026_v5 = vadd.f32 %v2621_v3, %v2018_v2  ;;  %v2632_v2 = vld [vmem:[%s839_s24] ss:$0 sm:$0xff] }
 0x844   : > { %v2019_v4 = vmul.f32 %v2620_v0, %v2011_v45 }
 0x846   : > { %v2027_v6 = vadd.f32 %v2621_v3, %v2019_v4  ;;  %v2633_v4 = vld [vmem:[%s842_s18] ss:$0 sm:$0xff] }
 0x848   : > { %v2028_v7 = vpack.c.bf16 %v2027_v6, %v2026_v5 }
 0x84a   : > { %2821 = vmatmul.mubr.msk.bf16.vlgmr.msra.gmra.mxu0 %vm924_vm2, %v2028_v7 }
 0x90a   : > { %v2089_v13 = vpop.f32.mrf.mxu0 }
 0x90b   : > { %v2090_v15 = vadd.f32 %v2622_v12, %v2089_v13 }
 0x90c   : > { %v2822_v16 = vpop.f32.mrf.mxu0 }
 0x90d   : > { %v2098_v17 = vmul.f32 0.044715, %v2090_v15  ;;  %v2096_v31 = vmul.f32 0.5, %v2090_v15 }
 0x90e   : > { %v2092_v18 = vpop.f32.mrf.mxu0 }
 0x90f   : > { %v2100_v19 = vmul.f32 %v2098_v17, %v2090_v15  ;;  %v2093_v20 = vadd.f32 %v2622_v12, %v2092_v18 }
 0x910   : > { %v2823_v22 = vpop.f32.mrf.mxu0 }
 0x911   : > { %v2102_v23 = vmul.f32 %v2100_v19, %v2090_v15  ;;  %v2099_v24 = vmul.f32 0.044715, %v2093_v20  ;;  %v2097_v33 = vmul.f32 0.5, %v2093_v20 }
 0x913   : > { %v2104_v25 = vadd.f32 %v2102_v23, %v2090_v15  ;;  %v2101_v14 = vmul.f32 %v2099_v24, %v2093_v20 }
 0x915   : > { %v2106_v21 = vmul.f32 0.7978846, %v2104_v25  ;;  %v2103_v32 = vmul.f32 %v2101_v14, %v2093_v20 }
 0x917   : > { %2947 = vtanh.f32 %v2106_v21  ;;  %v2105_v26 = vadd.f32 %v2103_v32, %v2093_v20 }
 0x919   : > { %v2107_v27 = vmul.f32 0.7978846, %v2105_v26 }
 0x91b   : > { %2949 = vtanh.f32 %v2107_v27 }
 0x924   : > { %v2948_v28 = vpop.eup %2947 }
 0x925   : > { %v2110_v29 = vadd.f32 1.0, %v2948_v28 }
 0x927   : > { %v2112_v37 = vmul.f32 %v2110_v29, %v2096_v31 }
 0x928   : > { %v2950_v30 = vpop.eup %2949 }
 0x929   : > { %v2111_v36 = vadd.f32 1.0, %v2950_v30 }
 0x92b   : > { %v2113_v38 = vmul.f32 %v2111_v36, %v2097_v33 }
 0x92d   : > { %v2114_v39 = vpack.c.bf16 %v2113_v38, %v2112_v37 }
 0x92f   : > { %2833 = vmatmul.mubr.msk.bf16.vlgmr.msra.gmra.mxu1 %vm2154_vm7, %v2114_v39 }
 0x9ef   : > { %v2192_v43 = vpop.f32.mrf.mxu1 }
 0x9f0   : > { %v2193_v44 = vadd.f32 %v2626_v42, %v2192_v43 }
 0x9f1   : > { %v2834_v46 = vpop.f32.mrf.mxu1 }
 0x9f2   : > { %v2199_v41 = vadd.f32 %v2193_v44, %v2026_v5 }
 0x9f3   : > { %v2195_v47 = vpop.f32.mrf.mxu1 }
 0x9f4   : > { %v2196_v48 = vadd.f32 %v2626_v42, %v2195_v47  ;;  %v2203_v40 = vsel %vm924_vm2, %v2199_v41, 0.0 }
 0x9f5   : > { %2204 = vadd.xlane.f32.xlu0 %v2203_v40  ;;  %v2835_v49 = vpop.f32.mrf.mxu1 }
 0x9f6   : > { %v2200_v50 = vadd.f32 %v2196_v48, %v2027_v6 }
 0x9f8   : > { %v2206_v51 = vsel %vm924_vm2, %v2200_v50, 0.0 }
 0x9f9   : > { %2207 = vadd.xlane.f32.xlu1 %v2206_v51 }
 0xa7e   : > { %v2205_v34 = vpop.xlane.xlu0 %2204 }
 0xa7f   : > { %v2209_v52 = vmul.f32 0.03125, %v2205_v34 }
 0xa81   : > { %v2211_v53 = vsub.f32 %v2199_v41, %v2209_v52 }
 0xa82   : > { %v2208_v54 = vpop.xlane.xlu1 %2207 }
 0xa83   : > { %v2210_v35 = vmul.f32 0.03125, %v2208_v54  ;;  %v2213_v55 = vmul.f32 %v2211_v53, %v2211_v53 }
 0xa85   : > { %v2212_v56 = vsub.f32 %v2200_v50, %v2210_v35  ;;  %v2215_v57 = vsel %vm924_vm2, %v2213_v55, 0.0 }
 0xa86   : > { %2216 = vadd.xlane.f32.xlu0 %v2215_v57 }
 0xa87   : > { %v2214_v58 = vmul.f32 %v2212_v56, %v2212_v56 }
 0xa89   : > { %v2218_v59 = vsel %vm924_vm2, %v2214_v58, 0.0 }
 0xa8a   : > { %2219 = vadd.xlane.f32.xlu1 %v2218_v59 }
 0xb0f   : > { %v2217_v60 = vpop.xlane.xlu0 %2216 }
 0xb10   : > { %v2221_v61 = vmul.f32 0.03125, %v2217_v60 }
 0xb12   : > { %v2223_v62 = vadd.f32 1e-12, %v2221_v61 }
 0xb13   : > { %v2220_v63 = vpop.xlane.xlu1 %2219 }
 0xb14   : > { %2951 = vrsqrt.f32 %v2223_v62  ;;  %v2222_v0 = vmul.f32 0.03125, %v2220_v63 }
 0xb16   : > { %v2224_v1 = vadd.f32 1e-12, %v2222_v0 }
 0xb18   : > { %2953 = vrsqrt.f32 %v2224_v1 }
 0xb21   : > { %v2952_v45 = vpop.eup %2951 }
 0xb22   : > { %v2227_v3 = vmul.f32 %v2952_v45, %v2211_v53 }
 0xb24   : > { %v2235_v5 = vmul.f32 %v2632_v2, %v2227_v3 }
 0xb25   : > { %v2954_v6 = vpop.eup %2953 }
 0xb26   : > { %v2243_v7 = vadd.f32 %v2633_v4, %v2235_v5  ;;  %v2228_v8 = vmul.f32 %v2954_v6, %v2212_v56 }
 0xb28   : > { %2245 = vst.msk [vmem:[#allocation2] sm:$0xff] %vm924_vm2, %v2243_v7  ;;  %v2236_v9 = vmul.f32 %v2632_v2, %v2228_v8  ;;  %2250 = sbr.rel (%p2634_p5) target bundleno = 3467 (0xd8b), region = 116 }
 0xb2a   : > { %v2244_v10 = vadd.f32 %v2633_v4, %v2236_v9 }
 0xb2c   : > { %2246 = vst.msk [vmem:[#allocation2 + $0x8] sm:$0xff] %vm924_vm2, %v2244_v10 }
 0xb2d   : > { %v2955_v11 = vld [vmem:[%s3524_s16 + $0x8] sm:$0xff]   ;;  %v2983_v12 = vmov 0.0   ;;  %v2956_v13 = vld [vmem:[%s3524_s16] sm:$0xff]   ;;  %vm2984_vm8 = vmmov 0   ;;  %v2252_v15 = vrot.slane %v2244_v10, 7  ;;  %vm2254_vm9 = vcmask 1040384  }
 0xb2e   : > { %2836 = vmatprep.subr.bf16.mxu0 %v2983_v12  ;;  %2844 = vmatprep.subr.bf16.mxu1 %v2983_v12  ;;  %v2957_v18 = vld [vmem:[%s3559_s1] sm:$0xff]   ;;  %v2642_v37 = vld [vmem:[#allocation3] ss:$0 sm:$0xff]  ;;  %vm2443_vm10 = vcmask 1024  }
 0xb2f   : > { %2837 = vmatpush3.bf16.msra.mxu0 %v2955_v11  ;;  %2840 = vmatprep.mubr.msk.bf16.mxu0 %vm2984_vm8, %v2983_v12  ;;  %v2255_v16 = vsel %vm2254_vm9, %v2243_v7, %v2252_v15  ;;  %v2635_v19 = vld [vmem:[%s3560_s20] ss:$0 sm:$0xff] }
 0xb30   : > { %2838 = vmatprep.subr.bf16.mxu0 %v2983_v12  ;;  %2846 = vmatprep.mubr.msk.bf16.mxu1 %vm2984_vm8, %v2983_v12  ;;  %v2256_v17 = vpack.c.bf16 %v2255_v16, %v2255_v16  ;;  %v2958_v14 = vld [vmem:[%s3561_s6] sm:$0xff]  }
 0xb31   : > { %2845 = vmatpush3.bf16.msra.mxu1 %v2957_v18  ;;  %v2639_v26 = vld [vmem:[%s3562_s0] ss:$0 sm:$0xff] }
 0xb32   : > { %2850 = vmatprep.subr.bf16.mxu1 %v2983_v12 }
 0xb33   : > { %2839 = vmatpush3.bf16.msra.mxu0 %v2956_v13 }
 0xb36   : > { %2841 = vmatmul.mubr.msk.bf16.vlgmr.msra.gmra.mxu0 %vm924_vm2, %v2256_v17 }
 0xbf6   : > { %v2317_v20 = vpop.f32.mrf.mxu0 }
 0xbf7   : > { %v2318_v22 = vadd.f32 %v2635_v19, %v2317_v20 }
 0xbf8   : > { %v2842_v23 = vpop.f32.mrf.mxu0 }
 0xbf9   : > { %v2323_v24 = vmax.f32 %v2318_v22, 0.0 }
 0xbfa   : > { %v2320_v25 = vpop.f32.mrf.mxu0 }
 0xbfb   : > { %v2324_v21 = vpack.c.bf16 %v2323_v24, %v2323_v24 }
 0xbfc   : > { %v2843_v32 = vpop.f32.mrf.mxu0 }
 0xbfd   : > { %2847 = vmatmul.mubr.msk.bf16.vlgmr.msra.gmra.mxu1 %vm1439_vm5, %v2324_v21 }
 0xbfe   : > { %2851 = vmatpush3.bf16.msra.mxu1 %v2958_v14  ;;  %2852 = vmatprep.mubr.msk.bf16.mxu1 %vm2984_vm8, %v2983_v12 }
 0xcbd   : > { %v2377_v27 = vpop.f32.mrf.mxu1 }
 0xcbe   : > { %v2378_v28 = vadd.f32 %v2639_v26, %v2377_v27 }
 0xcbf   : > { %v2848_v29 = vpop.f32.mrf.mxu1 }
 0xcc0   : > { %v2383_v30 = vmax.f32 %v2378_v28, 0.0 }
 0xcc1   : > { %v2380_v31 = vpop.f32.mrf.mxu1 }
 0xcc2   : > { %v2384_v33 = vpack.c.bf16 %v2383_v30, %v2383_v30 }
 0xcc3   : > { %v2849_v36 = vpop.f32.mrf.mxu1 }
 0xcc4   : > { %2853 = vmatmul.mubr.msk.bf16.vlgmr.msra.gmra.mxu1 %vm1439_vm5, %v2384_v33 }
 0xd84   : > { %v2437_v38 = vpop.f32.mrf.mxu1 }
 0xd85   : > { %v2438_v39 = vadd.f32 %v2642_v37, %v2437_v38 }
 0xd86   : > { %v2854_v42 = vpop.f32.mrf.mxu1 }
 0xd87   : > { %2444 = vst.msk [vmem:[%s3563_s2] sm:$0x3] %vm2443_vm10, %v2438_v39 }
 0xd88   : > { %v2440_v43 = vpop.f32.mrf.mxu1 }
 0xd8a   : > { %v2855_v44 = vpop.f32.mrf.mxu1 }
 0xd8b PF: > { %s3564_s24 = sld [smem:[#allocation4_spill]] }
 0xd91   : > { %s34_s29 = sadd.s32 1, %s3564_s24  }
 0xd92   : > { %p31_p6 = scmp.ge.s32.totalorder %s34_s29, 4  }
 0xd94   :  { %33 = sbr.rel (!%p31_p6) target bundleno = 13 (0xd), region = 175 }

</bundles_post_ra>
